<compile_context>
chip_gen: v7x
topology: tpu7x:2x2x1
jax: 0.10.0
libtpu: 0.0.40
codegen_flags: <defaults>
</compile_context>

<pallas_src>
import math

import jax
import jax.numpy as jnp
from jax.experimental import pallas as pl
from jax.experimental.pallas import tpu as pltpu

# ----------------------------- hyper-parameters -----------------------------
STATE_DIM = 6
CONFIG_DIM = 4
IN_DIM = STATE_DIM + CONFIG_DIM
FEATURE_DIM = 32            # d_model
NUM_LAYERS = 2
NHEAD = 8
HEAD_DIM = FEATURE_DIM // NHEAD
FF_DIM = 4 * FEATURE_DIM
LN_EPS = 1e-5
OUT_PAD = 128               # lane-dense output width; result lives in [:, :STATE_DIM]
assert FF_DIM == OUT_PAD    # the "wide" slab packs ff1 weights and the padded o2 head

BATCH = 2
SEQ_MEM = 8                 # memory (E_f) sequence length

# ----------------------------- slab index layout -----------------------------
# w_dd slab: (NUM_W_DD, D, D), every entry pre-transposed to (in, out)
W_SA, W_CA_Q, W_CA_K, W_CA_V, W_CA_OUT = 0, 1, 2, 3, 4     # + W_PER_LAYER*layer
W_PER_LAYER = 5
W_O1 = NUM_LAYERS * W_PER_LAYER                            # out_proj first linear
W_BD = W_O1 + 1                                            # head-reduce (cols>=H zero)
W_BDT = W_O1 + 2                                           # head-expand (rows>=H zero)
NUM_W_DD = W_O1 + 3

# b_d slab: (NUM_B_D, D)  -- 2-D so it pads to a single (32,128) VMEM tile
B_SA, B_CA_Q, B_CA_K, B_CA_V, B_CA_OUT = 0, 1, 2, 3, 4     # + B_PER_LAYER*layer
B_LN1_W, B_LN1_B, B_LN2_W, B_LN2_B, B_LN3_W, B_LN3_B = 5, 6, 7, 8, 9, 10
B_FF2 = 11
B_PER_LAYER = 12
B_LNF_W = NUM_LAYERS * B_PER_LAYER
B_LNF_B = B_LNF_W + 1
B_O1 = B_LNF_W + 2
NUM_B_D = B_O1 + 1

# wide slabs: w_wide (NUM_LAYERS+1, D, 128) = [ff1_l0, ff1_l1, o2_padded]
#             b_wide (NUM_LAYERS+1, 128)    = [ff1_b_l0, ff1_b_l1, o2_b_padded]
W_O2 = NUM_LAYERS


# --------------------------------- kernel -----------------------------------
def residual_estimation_kernel(q0_ref, ef_ref, w_dd_ref, w_wide_ref, w_ff2_ref,
                               b_d_ref, b_wide_ref, out_ref):
    D = FEATURE_DIM
    B = q0_ref.shape[0]
    S = ef_ref.shape[0] // B

    def b(i):
        return b_d_ref[i:i + 1]                                  # (1, D) row

    def ln(v, wi, bi):
        # var = E[x^2] - mu^2: the two cross-lane reductions are independent.
        mu = jnp.mean(v, axis=-1, keepdims=True)
        ms = jnp.mean(v * v, axis=-1, keepdims=True)
        inv = jax.lax.rsqrt(ms - mu * mu + LN_EPS)
        return (v - mu) * inv * b(wi) + b(bi)

    bd = w_dd_ref[W_BD]                                          # (D, D)
    bd_t = w_dd_ref[W_BDT]                                       # (D, D)

    ef = ef_ref[...]                                             # (B*S, D)

    # Memory-side K/V projections are independent of x: hoist them for both
    # layers off the serial chain so the scheduler overlaps them with the
    # query-side work.  K and V are separate results (no sub-tile lane slices).
    k3, v3 = [], []
    for l in range(NUM_LAYERS):
        wb, bb = l * W_PER_LAYER, l * B_PER_LAYER
        k3.append((jnp.dot(ef, w_dd_ref[wb + W_CA_K],
                           preferred_element_type=jnp.float32)
                   + b(bb + B_CA_K)).reshape(B, S, D))
        v3.append((jnp.dot(ef, w_dd_ref[wb + W_CA_V],
                           preferred_element_type=jnp.float32)
                   + b(bb + B_CA_V)).reshape(B, S, D))

    x = q0_ref[...]                                              # (B, D)
    for l in range(NUM_LAYERS):
        wb, bb = l * W_PER_LAYER, l * B_PER_LAYER

        # ---- fused [query_proj(+pos) for layer 0] + self-attn(V,out) + residual
        # One matmul replaces (proj, V-proj, out-proj, residual add).
        # Valid for tgt_len == 1, no masks, eval-mode dropout.
        x = ln(jnp.dot(x, w_dd_ref[wb + W_SA],
                       preferred_element_type=jnp.float32) + b(bb + B_SA),
               bb + B_LN1_W, bb + B_LN1_B)

        # ---- cross-attention over memory E_f (1/sqrt(dh) pre-folded into Q) ----
        q = jnp.dot(x, w_dd_ref[wb + W_CA_Q],
                    preferred_element_type=jnp.float32) + b(bb + B_CA_Q)   # (B, D)
        qk = q[:, None, :] * k3[l]                                         # (B, S, D)
        scores = jnp.dot(qk.reshape(B * S, D), bd,
                         preferred_element_type=jnp.float32).reshape(B, S, D)
        m = jnp.max(scores, axis=1, keepdims=True)
        p = jnp.exp(scores - m)
        p = p / jnp.sum(p, axis=1, keepdims=True)        # exact divide (EUP idle)
        p_full = jnp.dot(p.reshape(B * S, D), bd_t,
                         preferred_element_type=jnp.float32).reshape(B, S, D)
        ctx = jnp.sum(p_full * v3[l], axis=1)                              # (B, D)
        ca = jnp.dot(ctx, w_dd_ref[wb + W_CA_OUT],
                     preferred_element_type=jnp.float32) + b(bb + B_CA_OUT)
        x = ln(x + ca, bb + B_LN2_W, bb + B_LN2_B)

        # ---- feed-forward block ------------------------------------------------
        h1 = jnp.maximum(
            jnp.dot(x, w_wide_ref[l], preferred_element_type=jnp.float32)
            + b_wide_ref[l:l + 1], 0.0)                                    # (B, FF)
        ff = jnp.dot(h1, w_ff2_ref[l],
                     preferred_element_type=jnp.float32) + b(bb + B_FF2)
        x = ln(x + ff, bb + B_LN3_W, bb + B_LN3_B)

    # ---- final LayerNorm + output MLP (lane-dense padded output) ---------------
    x = ln(x, B_LNF_W, B_LNF_B)
    h1 = jnp.maximum(
        jnp.dot(x, w_dd_ref[W_O1], preferred_element_type=jnp.float32)
        + b(B_O1), 0.0)
    out_ref[...] = (jnp.dot(h1, w_wide_ref[W_O2],
                            preferred_element_type=jnp.float32)
                    + b_wide_ref[W_O2:W_O2 + 1])


# ------------------------------ parameter setup ------------------------------
def init_params(key):
    D, L = FEATURE_DIM, NUM_LAYERS
    keys = iter(jax.random.split(key, 32))

    def w(shape, scale=0.1):
        return jax.random.normal(next(keys), shape, jnp.float32) * scale

    return {
        'wq': w((D, IN_DIM)),
        'bq': w((1, D), 0.01),
        'pos': w((1, D)),
        'sa_in_w': w((L, 3 * D, D)),
        'sa_in_b': w((L, 1, 3 * D), 0.01),
        'sa_out_w': w((L, D, D)),
        'sa_out_b': w((L, 1, D), 0.01),
        'ca_in_w': w((L, 3 * D, D)),
        'ca_in_b': w((L, 1, 3 * D), 0.01),
        'ca_out_w': w((L, D, D)),
        'ca_out_b': w((L, 1, D), 0.01),
        'ln1_w': jnp.ones((L, 1, D), jnp.float32),
        'ln1_b': jnp.zeros((L, 1, D), jnp.float32),
        'ln2_w': jnp.ones((L, 1, D), jnp.float32),
        'ln2_b': jnp.zeros((L, 1, D), jnp.float32),
        'ln3_w': jnp.ones((L, 1, D), jnp.float32),
        'ln3_b': jnp.zeros((L, 1, D), jnp.float32),
        'ff1_w': w((L, FF_DIM, D)),
        'ff1_b': w((L, 1, FF_DIM), 0.01),
        'ff2_w': w((L, D, FF_DIM)),
        'ff2_b': w((L, 1, D), 0.01),
        'lnf_w': jnp.ones((1, D), jnp.float32),
        'lnf_b': jnp.zeros((1, D), jnp.float32),
        'o1_w': w((D, D)),
        'o1_b': w((1, D), 0.01),
        'o2_w': w((STATE_DIM, D)),
        'o2_b': w((1, STATE_DIM), 0.01),
    }


def pack_params(p):
    """Wrapper-side transposes / algebraic folding / padding (free XLA ops)."""
    D, L, dh = FEATURE_DIM, NUM_LAYERS, HEAD_DIM
    scale = 1.0 / math.sqrt(dh)
    eye = jnp.eye(D, dtype=jnp.float32)

    # query_proj in (in, out) orientation, zero-padded rows beyond IN_DIM
    wq_io = jnp.zeros((D, D), jnp.float32).at[:IN_DIM, :].set(p['wq'].T)
    bq = p['bq'] + p['pos']                                      # (1, D)

    w_dd, b_d = [], []
    for l in range(L):
        # Fused self-attention (tgt_len==1):  x + (xWv+bv)Wo + bo == x Wsa + bsa
        wv_io = p['sa_in_w'][l][2 * D:3 * D, :].T
        wo_io = p['sa_out_w'][l].T
        w_sa = eye + wv_io @ wo_io
        b_sa = p['sa_in_b'][l][:, 2 * D:3 * D] @ wo_io + p['sa_out_b'][l]
        if l == 0:
            # Pre-multiply query_proj (+pos) into layer-0's fused SA affine.
            b_sa = bq @ w_sa + b_sa
            w_sa = wq_io @ w_sa
        w_dd.append(w_sa)
        # cross-attention weights; softmax scale folded into Q
        w_dd.append(p['ca_in_w'][l][0:D, :].T * scale)
        w_dd.append(p['ca_in_w'][l][D:2 * D, :].T)
        w_dd.append(p['ca_in_w'][l][2 * D:3 * D, :].T)
        w_dd.append(p['ca_out_w'][l].T)
        b_d += [b_sa,
                p['ca_in_b'][l][:, 0:D] * scale,
                p['ca_in_b'][l][:, D:2 * D],
                p['ca_in_b'][l][:, 2 * D:3 * D],
                p['ca_out_b'][l],
                p['ln1_w'][l], p['ln1_b'][l], p['ln2_w'][l], p['ln2_b'][l],
                p['ln3_w'][l], p['ln3_b'][l], p['ff2_b'][l]]
    w_dd.append(p['o1_w'].T)
    # head-reduce / head-expand block-diagonal selectors, zero-padded to (D, D)
    heads = jnp.arange(D) // dh                                  # feature -> head id
    bd = (heads[:, None] == jnp.arange(D)[None, :]).astype(jnp.float32)
    w_dd.append(bd)
    w_dd.append(bd.T)
    w_dd = jnp.stack(w_dd)                                       # (NUM_W_DD, D, D)

    b_d += [p['lnf_w'], p['lnf_b'], p['o1_b']]
    b_d = jnp.concatenate(b_d, axis=0)                           # (NUM_B_D, D)

    # wide slab: ff1 weights per layer + padded output head (all (D, 128))
    w_o2 = jnp.zeros((D, OUT_PAD), jnp.float32).at[:, :STATE_DIM].set(p['o2_w'].T)
    w_wide = jnp.stack([p['ff1_w'][l].T for l in range(L)] + [w_o2])   # (L+1, D, 128)
    b_o2 = jnp.zeros((1, OUT_PAD), jnp.float32).at[:, :STATE_DIM].set(p['o2_b'])
    b_wide = jnp.concatenate([p['ff1_b'][l] for l in range(L)] + [b_o2], axis=0)

    w_ff2 = jnp.stack([p['ff2_w'][l].T for l in range(L)])       # (L, FF, D)

    return w_dd, w_wide, w_ff2, b_d, b_wide


# --------------------------------- wrapper -----------------------------------
@jax.jit
def residual_estimation_forward(s_pred_next, cfg, E_f, params):
    q0 = jnp.concatenate([s_pred_next, cfg], axis=-1).astype(jnp.float32)
    B = q0.shape[0]
    S = E_f.shape[0]
    q0_pad = jnp.zeros((B, FEATURE_DIM), jnp.float32).at[:, :IN_DIM].set(q0)
    ef_flat = jnp.transpose(E_f, (1, 0, 2)).reshape(B * S, FEATURE_DIM)
    ef_flat = ef_flat.astype(jnp.float32)

    inputs = (q0_pad, ef_flat) + pack_params(params)
    out = pl.pallas_call(
        residual_estimation_kernel,
        out_shape=jax.ShapeDtypeStruct((B, OUT_PAD), jnp.float32),
        in_specs=[pl.BlockSpec(memory_space=pltpu.MemorySpace.VMEM)] * len(inputs),
        out_specs=pl.BlockSpec(memory_space=pltpu.MemorySpace.VMEM),
        compiler_params=pltpu.CompilerParams(vmem_limit_bytes=4 * 1024 * 1024),
    )(*inputs)
    return out[:, :STATE_DIM]


# ----------------------------- pure-JAX reference ----------------------------
def reference_forward(s_pred_next, cfg, E_f, p):
    D, H, dh = FEATURE_DIM, NHEAD, HEAD_DIM

    def ln(v, w, b):
        mu = v.mean(-1, keepdims=True)
        var = ((v - mu) ** 2).mean(-1, keepdims=True)
        return (v - mu) / jnp.sqrt(var + LN_EPS) * w + b

    def lin(v, w, b):
        return v @ w.T + b

    x = lin(jnp.concatenate([s_pred_next, cfg], -1), p['wq'], p['bq']) + p['pos']
    ef = jnp.transpose(E_f, (1, 0, 2))           # (B, S, D)
    B, S, _ = ef.shape
    for l in range(NUM_LAYERS):
        # self-attention with tgt length 1 == value path only
        in_w, in_b = p['sa_in_w'][l], p['sa_in_b'][l]
        v = x @ in_w[2 * D:].T + in_b[:, 2 * D:]
        x = ln(x + lin(v, p['sa_out_w'][l], p['sa_out_b'][l]),
               p['ln1_w'][l], p['ln1_b'][l])
        cw, cb = p['ca_in_w'][l], p['ca_in_b'][l]
        q = x @ cw[:D].T + cb[:, :D]
        k = ef @ cw[D:2 * D].T + cb[:, D:2 * D]
        v = ef @ cw[2 * D:].T + cb[:, 2 * D:]
        qh = q.reshape(B, H, dh)
        kh = k.reshape(B, S, H, dh)
        vh = v.reshape(B, S, H, dh)
        scores = jnp.einsum('bhd,bshd->bhs', qh, kh) / math.sqrt(dh)
        pw = jax.nn.softmax(scores, axis=-1)
        o = jnp.einsum('bhs,bshd->bhd', pw, vh).reshape(B, D)
        x = ln(x + lin(o, p['ca_out_w'][l], p['ca_out_b'][l]),
               p['ln2_w'][l], p['ln2_b'][l])
        h1 = jax.nn.relu(lin(x, p['ff1_w'][l], p['ff1_b'][l]))
        x = ln(x + lin(h1, p['ff2_w'][l], p['ff2_b'][l]),
               p['ln3_w'][l], p['ln3_b'][l])
    x = ln(x, p['lnf_w'], p['lnf_b'])
    h1 = jax.nn.relu(lin(x, p['o1_w'], p['o1_b']))
    return lin(h1, p['o2_w'], p['o2_b'])


# ----------------------------------- main ------------------------------------
if __name__ == "__main__":
    key = jax.random.PRNGKey(0)
    kp, k1, k2, k3 = jax.random.split(key, 4)
    params = init_params(kp)

    s_pred_next = jax.random.normal(k1, (BATCH, STATE_DIM), jnp.float32)
    cfg = jax.random.normal(k2, (BATCH, CONFIG_DIM), jnp.float32)
    E_f = jax.random.normal(k3, (SEQ_MEM, BATCH, FEATURE_DIM), jnp.float32)  # (S, B, D)

    out = residual_estimation_forward(s_pred_next, cfg, E_f, params)
    out = jax.block_until_ready(out)

    ref = reference_forward(s_pred_next, cfg, E_f, params)
    assert out.shape == (BATCH, STATE_DIM)
    if not jnp.allclose(out, ref, atol=1e-3, rtol=1e-3):
        raise AssertionError(
            f"Pallas/JAX mismatch: max abs diff = {float(jnp.max(jnp.abs(out - ref)))}")

    print("KERNEL_OK")
</pallas_src>

<mosaic_0001>
module attributes {stable_mosaic.version = 11 : i64} {
  func.func @residual_estimation_kernel(%arg0: memref<2x32xf32, #tpu.memory_space<vmem>>, %arg1: memref<16x32xf32, #tpu.memory_space<vmem>>, %arg2: memref<13x32x32xf32, #tpu.memory_space<vmem>>, %arg3: memref<3x32x128xf32, #tpu.memory_space<vmem>>, %arg4: memref<2x128x32xf32, #tpu.memory_space<vmem>>, %arg5: memref<27x32xf32, #tpu.memory_space<vmem>>, %arg6: memref<3x128xf32, #tpu.memory_space<vmem>>, %arg7: memref<2x128xf32, #tpu.memory_space<vmem>>) attributes {dimension_semantics = [], scalar_prefetch = 0 : i64, scratch_operands = 0 : i64, tpu.core_type = #tpu.core_type<tc>} {
    %c11 = arith.constant 11 : index
    %c0 = arith.constant 0 : index
    %c0_0 = arith.constant 0 : index
    %0 = vector.load %arg2[%c11, %c0, %c0_0] : memref<13x32x32xf32, #tpu.memory_space<vmem>>, vector<1x32x32xf32>
    %1 = vector.shape_cast %0 : vector<1x32x32xf32> to vector<32x32xf32>
    %c12 = arith.constant 12 : index
    %c0_1 = arith.constant 0 : index
    %c0_2 = arith.constant 0 : index
    %2 = vector.load %arg2[%c12, %c0_1, %c0_2] : memref<13x32x32xf32, #tpu.memory_space<vmem>>, vector<1x32x32xf32>
    %3 = vector.shape_cast %2 : vector<1x32x32xf32> to vector<32x32xf32>
    %c0_3 = arith.constant 0 : index
    %c0_4 = arith.constant 0 : index
    %4 = vector.load %arg1[%c0_3, %c0_4] : memref<16x32xf32, #tpu.memory_space<vmem>>, vector<16x32xf32>
    %c2 = arith.constant 2 : index
    %c0_5 = arith.constant 0 : index
    %c0_6 = arith.constant 0 : index
    %5 = vector.load %arg2[%c2, %c0_5, %c0_6] : memref<13x32x32xf32, #tpu.memory_space<vmem>>, vector<1x32x32xf32>
    %6 = vector.shape_cast %5 : vector<1x32x32xf32> to vector<32x32xf32>
    %cst = arith.constant dense<0.000000e+00> : vector<16x32xf32>
    %7 = tpu.matmul %4, %6, %cst {dimension_numbers = #tpu.dot_dimension_numbers<[1], [0], [0], [1], [0, 0, 1, 1], [], []>} : vector<16x32xf32>, vector<32x32xf32>, vector<16x32xf32> -> vector<16x32xf32>
    %c2_7 = arith.constant 2 : index
    %c0_8 = arith.constant 0 : index
    %8 = vector.load %arg5[%c2_7, %c0_8] : memref<27x32xf32, #tpu.memory_space<vmem>>, vector<1x32xf32>
    %9 = vector.broadcast %8 : vector<1x32xf32> to vector<16x32xf32>
    %10 = arith.addf %7, %9 : vector<16x32xf32>
    %11 = vector.shape_cast %10 : vector<16x32xf32> to vector<2x8x32xf32>
    %c3 = arith.constant 3 : index
    %c0_9 = arith.constant 0 : index
    %c0_10 = arith.constant 0 : index
    %12 = vector.load %arg2[%c3, %c0_9, %c0_10] : memref<13x32x32xf32, #tpu.memory_space<vmem>>, vector<1x32x32xf32>
    %13 = vector.shape_cast %12 : vector<1x32x32xf32> to vector<32x32xf32>
    %cst_11 = arith.constant dense<0.000000e+00> : vector<16x32xf32>
    %14 = tpu.matmul %4, %13, %cst_11 {dimension_numbers = #tpu.dot_dimension_numbers<[1], [0], [0], [1], [0, 0, 1, 1], [], []>} : vector<16x32xf32>, vector<32x32xf32>, vector<16x32xf32> -> vector<16x32xf32>
    %c3_12 = arith.constant 3 : index
    %c0_13 = arith.constant 0 : index
    %15 = vector.load %arg5[%c3_12, %c0_13] : memref<27x32xf32, #tpu.memory_space<vmem>>, vector<1x32xf32>
    %16 = vector.broadcast %15 : vector<1x32xf32> to vector<16x32xf32>
    %17 = arith.addf %14, %16 : vector<16x32xf32>
    %18 = vector.shape_cast %17 : vector<16x32xf32> to vector<2x8x32xf32>
    %c7 = arith.constant 7 : index
    %c0_14 = arith.constant 0 : index
    %c0_15 = arith.constant 0 : index
    %19 = vector.load %arg2[%c7, %c0_14, %c0_15] : memref<13x32x32xf32, #tpu.memory_space<vmem>>, vector<1x32x32xf32>
    %20 = vector.shape_cast %19 : vector<1x32x32xf32> to vector<32x32xf32>
    %cst_16 = arith.constant dense<0.000000e+00> : vector<16x32xf32>
    %21 = tpu.matmul %4, %20, %cst_16 {dimension_numbers = #tpu.dot_dimension_numbers<[1], [0], [0], [1], [0, 0, 1, 1], [], []>} : vector<16x32xf32>, vector<32x32xf32>, vector<16x32xf32> -> vector<16x32xf32>
    %c14 = arith.constant 14 : index
    %c0_17 = arith.constant 0 : index
    %22 = vector.load %arg5[%c14, %c0_17] : memref<27x32xf32, #tpu.memory_space<vmem>>, vector<1x32xf32>
    %23 = vector.broadcast %22 : vector<1x32xf32> to vector<16x32xf32>
    %24 = arith.addf %21, %23 : vector<16x32xf32>
    %25 = vector.shape_cast %24 : vector<16x32xf32> to vector<2x8x32xf32>
    %c8 = arith.constant 8 : index
    %c0_18 = arith.constant 0 : index
    %c0_19 = arith.constant 0 : index
    %26 = vector.load %arg2[%c8, %c0_18, %c0_19] : memref<13x32x32xf32, #tpu.memory_space<vmem>>, vector<1x32x32xf32>
    %27 = vector.shape_cast %26 : vector<1x32x32xf32> to vector<32x32xf32>
    %cst_20 = arith.constant dense<0.000000e+00> : vector<16x32xf32>
    %28 = tpu.matmul %4, %27, %cst_20 {dimension_numbers = #tpu.dot_dimension_numbers<[1], [0], [0], [1], [0, 0, 1, 1], [], []>} : vector<16x32xf32>, vector<32x32xf32>, vector<16x32xf32> -> vector<16x32xf32>
    %c15 = arith.constant 15 : index
    %c0_21 = arith.constant 0 : index
    %29 = vector.load %arg5[%c15, %c0_21] : memref<27x32xf32, #tpu.memory_space<vmem>>, vector<1x32xf32>
    %30 = vector.broadcast %29 : vector<1x32xf32> to vector<16x32xf32>
    %31 = arith.addf %28, %30 : vector<16x32xf32>
    %32 = vector.shape_cast %31 : vector<16x32xf32> to vector<2x8x32xf32>
    %c0_22 = arith.constant 0 : index
    %c0_23 = arith.constant 0 : index
    %33 = vector.load %arg0[%c0_22, %c0_23] : memref<2x32xf32, #tpu.memory_space<vmem>>, vector<2x32xf32>
    %c0_24 = arith.constant 0 : index
    %c0_25 = arith.constant 0 : index
    %c0_26 = arith.constant 0 : index
    %34 = vector.load %arg2[%c0_24, %c0_25, %c0_26] : memref<13x32x32xf32, #tpu.memory_space<vmem>>, vector<1x32x32xf32>
    %35 = vector.shape_cast %34 : vector<1x32x32xf32> to vector<32x32xf32>
    %cst_27 = arith.constant dense<0.000000e+00> : vector<2x32xf32>
    %36 = tpu.matmul %33, %35, %cst_27 {dimension_numbers = #tpu.dot_dimension_numbers<[1], [0], [0], [1], [0, 0, 1, 1], [], []>} : vector<2x32xf32>, vector<32x32xf32>, vector<2x32xf32> -> vector<2x32xf32>
    %c0_28 = arith.constant 0 : index
    %c0_29 = arith.constant 0 : index
    %37 = vector.load %arg5[%c0_28, %c0_29] : memref<27x32xf32, #tpu.memory_space<vmem>>, vector<1x32xf32>
    %38 = vector.broadcast %37 : vector<1x32xf32> to vector<2x32xf32>
    %39 = arith.addf %36, %38 : vector<2x32xf32>
    %cst_30 = arith.constant dense<0.000000e+00> : vector<2xf32>
    %40 = vector.multi_reduction <add>, %39, %cst_30 [1] : vector<2x32xf32> to vector<2xf32>
    %41 = vector.shape_cast %40 : vector<2xf32> to vector<2x1xf32>
    %cst_31 = arith.constant 3.200000e+01 : f32
    %42 = vector.broadcast %cst_31 : f32 to vector<2x1xf32>
    %43 = arith.divf %41, %42 : vector<2x1xf32>
    %44 = arith.mulf %39, %39 : vector<2x32xf32>
    %cst_32 = arith.constant dense<0.000000e+00> : vector<2xf32>
    %45 = vector.multi_reduction <add>, %44, %cst_32 [1] : vector<2x32xf32> to vector<2xf32>
    %46 = vector.shape_cast %45 : vector<2xf32> to vector<2x1xf32>
    %cst_33 = arith.constant 3.200000e+01 : f32
    %47 = vector.broadcast %cst_33 : f32 to vector<2x1xf32>
    %48 = arith.divf %46, %47 : vector<2x1xf32>
    %49 = arith.mulf %43, %43 : vector<2x1xf32>
    %50 = arith.subf %48, %49 : vector<2x1xf32>
    %cst_34 = arith.constant 9.99999974E-6 : f32
    %51 = vector.broadcast %cst_34 : f32 to vector<2x1xf32>
    %52 = arith.addf %50, %51 : vector<2x1xf32>
    %53 = math.rsqrt %52 : vector<2x1xf32>
    %54 = vector.broadcast %43 : vector<2x1xf32> to vector<2x32xf32>
    %55 = arith.subf %39, %54 : vector<2x32xf32>
    %56 = vector.broadcast %53 : vector<2x1xf32> to vector<2x32xf32>
    %57 = arith.mulf %55, %56 : vector<2x32xf32>
    %c5 = arith.constant 5 : index
    %c0_35 = arith.constant 0 : index
    %58 = vector.load %arg5[%c5, %c0_35] : memref<27x32xf32, #tpu.memory_space<vmem>>, vector<1x32xf32>
    %59 = vector.broadcast %58 : vector<1x32xf32> to vector<2x32xf32>
    %60 = arith.mulf %57, %59 : vector<2x32xf32>
    %c6 = arith.constant 6 : index
    %c0_36 = arith.constant 0 : index
    %61 = vector.load %arg5[%c6, %c0_36] : memref<27x32xf32, #tpu.memory_space<vmem>>, vector<1x32xf32>
    %62 = vector.broadcast %61 : vector<1x32xf32> to vector<2x32xf32>
    %63 = arith.addf %60, %62 : vector<2x32xf32>
    %c1 = arith.constant 1 : index
    %c0_37 = arith.constant 0 : index
    %c0_38 = arith.constant 0 : index
    %64 = vector.load %arg2[%c1, %c0_37, %c0_38] : memref<13x32x32xf32, #tpu.memory_space<vmem>>, vector<1x32x32xf32>
    %65 = vector.shape_cast %64 : vector<1x32x32xf32> to vector<32x32xf32>
    %cst_39 = arith.constant dense<0.000000e+00> : vector<2x32xf32>
    %66 = tpu.matmul %63, %65, %cst_39 {dimension_numbers = #tpu.dot_dimension_numbers<[1], [0], [0], [1], [0, 0, 1, 1], [], []>} : vector<2x32xf32>, vector<32x32xf32>, vector<2x32xf32> -> vector<2x32xf32>
    %c1_40 = arith.constant 1 : index
    %c0_41 = arith.constant 0 : index
    %67 = vector.load %arg5[%c1_40, %c0_41] : memref<27x32xf32, #tpu.memory_space<vmem>>, vector<1x32xf32>
    %68 = vector.broadcast %67 : vector<1x32xf32> to vector<2x32xf32>
    %69 = arith.addf %66, %68 : vector<2x32xf32>
    %70 = vector.shape_cast %69 : vector<2x32xf32> to vector<2x1x32xf32>
    %71 = vector.broadcast %70 : vector<2x1x32xf32> to vector<2x8x32xf32>
    %72 = arith.mulf %71, %11 : vector<2x8x32xf32>
    %73 = vector.shape_cast %72 : vector<2x8x32xf32> to vector<16x32xf32>
    %cst_42 = arith.constant dense<0.000000e+00> : vector<16x32xf32>
    %74 = tpu.matmul %73, %1, %cst_42 {dimension_numbers = #tpu.dot_dimension_numbers<[1], [0], [0], [1], [0, 0, 1, 1], [], []>} : vector<16x32xf32>, vector<32x32xf32>, vector<16x32xf32> -> vector<16x32xf32>
    %75 = vector.shape_cast %74 : vector<16x32xf32> to vector<2x8x32xf32>
    %cst_43 = arith.constant dense<0xFF800000> : vector<2x32xf32>
    %76 = vector.multi_reduction <maximumf>, %75, %cst_43 [1] : vector<2x8x32xf32> to vector<2x32xf32>
    %77 = vector.shape_cast %76 : vector<2x32xf32> to vector<2x1x32xf32>
    %78 = vector.broadcast %77 : vector<2x1x32xf32> to vector<2x8x32xf32>
    %79 = arith.subf %75, %78 : vector<2x8x32xf32>
    %80 = math.exp %79 : vector<2x8x32xf32>
    %cst_44 = arith.constant dense<0.000000e+00> : vector<2x32xf32>
    %81 = vector.multi_reduction <add>, %80, %cst_44 [1] : vector<2x8x32xf32> to vector<2x32xf32>
    %82 = vector.shape_cast %81 : vector<2x32xf32> to vector<2x1x32xf32>
    %83 = vector.broadcast %82 : vector<2x1x32xf32> to vector<2x8x32xf32>
    %84 = arith.divf %80, %83 : vector<2x8x32xf32>
    %85 = vector.shape_cast %84 : vector<2x8x32xf32> to vector<16x32xf32>
    %cst_45 = arith.constant dense<0.000000e+00> : vector<16x32xf32>
    %86 = tpu.matmul %85, %3, %cst_45 {dimension_numbers = #tpu.dot_dimension_numbers<[1], [0], [0], [1], [0, 0, 1, 1], [], []>} : vector<16x32xf32>, vector<32x32xf32>, vector<16x32xf32> -> vector<16x32xf32>
    %87 = vector.shape_cast %86 : vector<16x32xf32> to vector<2x8x32xf32>
    %88 = arith.mulf %87, %18 : vector<2x8x32xf32>
    %cst_46 = arith.constant dense<0.000000e+00> : vector<2x32xf32>
    %89 = vector.multi_reduction <add>, %88, %cst_46 [1] : vector<2x8x32xf32> to vector<2x32xf32>
    %c4 = arith.constant 4 : index
    %c0_47 = arith.constant 0 : index
    %c0_48 = arith.constant 0 : index
    %90 = vector.load %arg2[%c4, %c0_47, %c0_48] : memref<13x32x32xf32, #tpu.memory_space<vmem>>, vector<1x32x32xf32>
    %91 = vector.shape_cast %90 : vector<1x32x32xf32> to vector<32x32xf32>
    %cst_49 = arith.constant dense<0.000000e+00> : vector<2x32xf32>
    %92 = tpu.matmul %89, %91, %cst_49 {dimension_numbers = #tpu.dot_dimension_numbers<[1], [0], [0], [1], [0, 0, 1, 1], [], []>} : vector<2x32xf32>, vector<32x32xf32>, vector<2x32xf32> -> vector<2x32xf32>
    %c4_50 = arith.constant 4 : index
    %c0_51 = arith.constant 0 : index
    %93 = vector.load %arg5[%c4_50, %c0_51] : memref<27x32xf32, #tpu.memory_space<vmem>>, vector<1x32xf32>
    %94 = vector.broadcast %93 : vector<1x32xf32> to vector<2x32xf32>
    %95 = arith.addf %92, %94 : vector<2x32xf32>
    %96 = arith.addf %63, %95 : vector<2x32xf32>
    %cst_52 = arith.constant dense<0.000000e+00> : vector<2xf32>
    %97 = vector.multi_reduction <add>, %96, %cst_52 [1] : vector<2x32xf32> to vector<2xf32>
    %98 = vector.shape_cast %97 : vector<2xf32> to vector<2x1xf32>
    %cst_53 = arith.constant 3.200000e+01 : f32
    %99 = vector.broadcast %cst_53 : f32 to vector<2x1xf32>
    %100 = arith.divf %98, %99 : vector<2x1xf32>
    %101 = arith.mulf %96, %96 : vector<2x32xf32>
    %cst_54 = arith.constant dense<0.000000e+00> : vector<2xf32>
    %102 = vector.multi_reduction <add>, %101, %cst_54 [1] : vector<2x32xf32> to vector<2xf32>
    %103 = vector.shape_cast %102 : vector<2xf32> to vector<2x1xf32>
    %cst_55 = arith.constant 3.200000e+01 : f32
    %104 = vector.broadcast %cst_55 : f32 to vector<2x1xf32>
    %105 = arith.divf %103, %104 : vector<2x1xf32>
    %106 = arith.mulf %100, %100 : vector<2x1xf32>
    %107 = arith.subf %105, %106 : vector<2x1xf32>
    %cst_56 = arith.constant 9.99999974E-6 : f32
    %108 = vector.broadcast %cst_56 : f32 to vector<2x1xf32>
    %109 = arith.addf %107, %108 : vector<2x1xf32>
    %110 = math.rsqrt %109 : vector<2x1xf32>
    %111 = vector.broadcast %100 : vector<2x1xf32> to vector<2x32xf32>
    %112 = arith.subf %96, %111 : vector<2x32xf32>
    %113 = vector.broadcast %110 : vector<2x1xf32> to vector<2x32xf32>
    %114 = arith.mulf %112, %113 : vector<2x32xf32>
    %c7_57 = arith.constant 7 : index
    %c0_58 = arith.constant 0 : index
    %115 = vector.load %arg5[%c7_57, %c0_58] : memref<27x32xf32, #tpu.memory_space<vmem>>, vector<1x32xf32>
    %116 = vector.broadcast %115 : vector<1x32xf32> to vector<2x32xf32>
    %117 = arith.mulf %114, %116 : vector<2x32xf32>
    %c8_59 = arith.constant 8 : index
    %c0_60 = arith.constant 0 : index
    %118 = vector.load %arg5[%c8_59, %c0_60] : memref<27x32xf32, #tpu.memory_space<vmem>>, vector<1x32xf32>
    %119 = vector.broadcast %118 : vector<1x32xf32> to vector<2x32xf32>
    %120 = arith.addf %117, %119 : vector<2x32xf32>
    %c0_61 = arith.constant 0 : index
    %c0_62 = arith.constant 0 : index
    %c0_63 = arith.constant 0 : index
    %121 = vector.load %arg3[%c0_61, %c0_62, %c0_63] : memref<3x32x128xf32, #tpu.memory_space<vmem>>, vector<1x32x128xf32>
    %122 = vector.shape_cast %121 : vector<1x32x128xf32> to vector<32x128xf32>
    %cst_64 = arith.constant dense<0.000000e+00> : vector<2x128xf32>
    %123 = tpu.matmul %120, %122, %cst_64 {dimension_numbers = #tpu.dot_dimension_numbers<[1], [0], [0], [1], [0, 0, 1, 1], [], []>} : vector<2x32xf32>, vector<32x128xf32>, vector<2x128xf32> -> vector<2x128xf32>
    %c0_65 = arith.constant 0 : index
    %c0_66 = arith.constant 0 : index
    %124 = vector.load %arg6[%c0_65, %c0_66] : memref<3x128xf32, #tpu.memory_space<vmem>>, vector<1x128xf32>
    %125 = vector.broadcast %124 : vector<1x128xf32> to vector<2x128xf32>
    %126 = arith.addf %123, %125 : vector<2x128xf32>
    %cst_67 = arith.constant 0.000000e+00 : f32
    %127 = vector.broadcast %cst_67 : f32 to vector<2x128xf32>
    %128 = arith.maximumf %126, %127 : vector<2x128xf32>
    %c0_68 = arith.constant 0 : index
    %c0_69 = arith.constant 0 : index
    %c0_70 = arith.constant 0 : index
    %129 = vector.load %arg4[%c0_68, %c0_69, %c0_70] : memref<2x128x32xf32, #tpu.memory_space<vmem>>, vector<1x128x32xf32>
    %130 = vector.shape_cast %129 : vector<1x128x32xf32> to vector<128x32xf32>
    %cst_71 = arith.constant dense<0.000000e+00> : vector<2x32xf32>
    %131 = tpu.matmul %128, %130, %cst_71 {dimension_numbers = #tpu.dot_dimension_numbers<[1], [0], [0], [1], [0, 0, 1, 1], [], []>} : vector<2x128xf32>, vector<128x32xf32>, vector<2x32xf32> -> vector<2x32xf32>
    %c11_72 = arith.constant 11 : index
    %c0_73 = arith.constant 0 : index
    %132 = vector.load %arg5[%c11_72, %c0_73] : memref<27x32xf32, #tpu.memory_space<vmem>>, vector<1x32xf32>
    %133 = vector.broadcast %132 : vector<1x32xf32> to vector<2x32xf32>
    %134 = arith.addf %131, %133 : vector<2x32xf32>
    %135 = arith.addf %120, %134 : vector<2x32xf32>
    %cst_74 = arith.constant dense<0.000000e+00> : vector<2xf32>
    %136 = vector.multi_reduction <add>, %135, %cst_74 [1] : vector<2x32xf32> to vector<2xf32>
    %137 = vector.shape_cast %136 : vector<2xf32> to vector<2x1xf32>
    %cst_75 = arith.constant 3.200000e+01 : f32
    %138 = vector.broadcast %cst_75 : f32 to vector<2x1xf32>
    %139 = arith.divf %137, %138 : vector<2x1xf32>
    %140 = arith.mulf %135, %135 : vector<2x32xf32>
    %cst_76 = arith.constant dense<0.000000e+00> : vector<2xf32>
    %141 = vector.multi_reduction <add>, %140, %cst_76 [1] : vector<2x32xf32> to vector<2xf32>
    %142 = vector.shape_cast %141 : vector<2xf32> to vector<2x1xf32>
    %cst_77 = arith.constant 3.200000e+01 : f32
    %143 = vector.broadcast %cst_77 : f32 to vector<2x1xf32>
    %144 = arith.divf %142, %143 : vector<2x1xf32>
    %145 = arith.mulf %139, %139 : vector<2x1xf32>
    %146 = arith.subf %144, %145 : vector<2x1xf32>
    %cst_78 = arith.constant 9.99999974E-6 : f32
    %147 = vector.broadcast %cst_78 : f32 to vector<2x1xf32>
    %148 = arith.addf %146, %147 : vector<2x1xf32>
    %149 = math.rsqrt %148 : vector<2x1xf32>
    %150 = vector.broadcast %139 : vector<2x1xf32> to vector<2x32xf32>
    %151 = arith.subf %135, %150 : vector<2x32xf32>
    %152 = vector.broadcast %149 : vector<2x1xf32> to vector<2x32xf32>
    %153 = arith.mulf %151, %152 : vector<2x32xf32>
    %c9 = arith.constant 9 : index
    %c0_79 = arith.constant 0 : index
    %154 = vector.load %arg5[%c9, %c0_79] : memref<27x32xf32, #tpu.memory_space<vmem>>, vector<1x32xf32>
    %155 = vector.broadcast %154 : vector<1x32xf32> to vector<2x32xf32>
    %156 = arith.mulf %153, %155 : vector<2x32xf32>
    %c10 = arith.constant 10 : index
    %c0_80 = arith.constant 0 : index
    %157 = vector.load %arg5[%c10, %c0_80] : memref<27x32xf32, #tpu.memory_space<vmem>>, vector<1x32xf32>
    %158 = vector.broadcast %157 : vector<1x32xf32> to vector<2x32xf32>
    %159 = arith.addf %156, %158 : vector<2x32xf32>
    %c5_81 = arith.constant 5 : index
    %c0_82 = arith.constant 0 : index
    %c0_83 = arith.constant 0 : index
    %160 = vector.load %arg2[%c5_81, %c0_82, %c0_83] : memref<13x32x32xf32, #tpu.memory_space<vmem>>, vector<1x32x32xf32>
    %161 = vector.shape_cast %160 : vector<1x32x32xf32> to vector<32x32xf32>
    %cst_84 = arith.constant dense<0.000000e+00> : vector<2x32xf32>
    %162 = tpu.matmul %159, %161, %cst_84 {dimension_numbers = #tpu.dot_dimension_numbers<[1], [0], [0], [1], [0, 0, 1, 1], [], []>} : vector<2x32xf32>, vector<32x32xf32>, vector<2x32xf32> -> vector<2x32xf32>
    %c12_85 = arith.constant 12 : index
    %c0_86 = arith.constant 0 : index
    %163 = vector.load %arg5[%c12_85, %c0_86] : memref<27x32xf32, #tpu.memory_space<vmem>>, vector<1x32xf32>
    %164 = vector.broadcast %163 : vector<1x32xf32> to vector<2x32xf32>
    %165 = arith.addf %162, %164 : vector<2x32xf32>
    %cst_87 = arith.constant dense<0.000000e+00> : vector<2xf32>
    %166 = vector.multi_reduction <add>, %165, %cst_87 [1] : vector<2x32xf32> to vector<2xf32>
    %167 = vector.shape_cast %166 : vector<2xf32> to vector<2x1xf32>
    %cst_88 = arith.constant 3.200000e+01 : f32
    %168 = vector.broadcast %cst_88 : f32 to vector<2x1xf32>
    %169 = arith.divf %167, %168 : vector<2x1xf32>
    %170 = arith.mulf %165, %165 : vector<2x32xf32>
    %cst_89 = arith.constant dense<0.000000e+00> : vector<2xf32>
    %171 = vector.multi_reduction <add>, %170, %cst_89 [1] : vector<2x32xf32> to vector<2xf32>
    %172 = vector.shape_cast %171 : vector<2xf32> to vector<2x1xf32>
    %cst_90 = arith.constant 3.200000e+01 : f32
    %173 = vector.broadcast %cst_90 : f32 to vector<2x1xf32>
    %174 = arith.divf %172, %173 : vector<2x1xf32>
    %175 = arith.mulf %169, %169 : vector<2x1xf32>
    %176 = arith.subf %174, %175 : vector<2x1xf32>
    %cst_91 = arith.constant 9.99999974E-6 : f32
    %177 = vector.broadcast %cst_91 : f32 to vector<2x1xf32>
    %178 = arith.addf %176, %177 : vector<2x1xf32>
    %179 = math.rsqrt %178 : vector<2x1xf32>
    %180 = vector.broadcast %169 : vector<2x1xf32> to vector<2x32xf32>
    %181 = arith.subf %165, %180 : vector<2x32xf32>
    %182 = vector.broadcast %179 : vector<2x1xf32> to vector<2x32xf32>
    %183 = arith.mulf %181, %182 : vector<2x32xf32>
    %c17 = arith.constant 17 : index
    %c0_92 = arith.constant 0 : index
    %184 = vector.load %arg5[%c17, %c0_92] : memref<27x32xf32, #tpu.memory_space<vmem>>, vector<1x32xf32>
    %185 = vector.broadcast %184 : vector<1x32xf32> to vector<2x32xf32>
    %186 = arith.mulf %183, %185 : vector<2x32xf32>
    %c18 = arith.constant 18 : index
    %c0_93 = arith.constant 0 : index
    %187 = vector.load %arg5[%c18, %c0_93] : memref<27x32xf32, #tpu.memory_space<vmem>>, vector<1x32xf32>
    %188 = vector.broadcast %187 : vector<1x32xf32> to vector<2x32xf32>
    %189 = arith.addf %186, %188 : vector<2x32xf32>
    %c6_94 = arith.constant 6 : index
    %c0_95 = arith.constant 0 : index
    %c0_96 = arith.constant 0 : index
    %190 = vector.load %arg2[%c6_94, %c0_95, %c0_96] : memref<13x32x32xf32, #tpu.memory_space<vmem>>, vector<1x32x32xf32>
    %191 = vector.shape_cast %190 : vector<1x32x32xf32> to vector<32x32xf32>
    %cst_97 = arith.constant dense<0.000000e+00> : vector<2x32xf32>
    %192 = tpu.matmul %189, %191, %cst_97 {dimension_numbers = #tpu.dot_dimension_numbers<[1], [0], [0], [1], [0, 0, 1, 1], [], []>} : vector<2x32xf32>, vector<32x32xf32>, vector<2x32xf32> -> vector<2x32xf32>
    %c13 = arith.constant 13 : index
    %c0_98 = arith.constant 0 : index
    %193 = vector.load %arg5[%c13, %c0_98] : memref<27x32xf32, #tpu.memory_space<vmem>>, vector<1x32xf32>
    %194 = vector.broadcast %193 : vector<1x32xf32> to vector<2x32xf32>
    %195 = arith.addf %192, %194 : vector<2x32xf32>
    %196 = vector.shape_cast %195 : vector<2x32xf32> to vector<2x1x32xf32>
    %197 = vector.broadcast %196 : vector<2x1x32xf32> to vector<2x8x32xf32>
    %198 = arith.mulf %197, %25 : vector<2x8x32xf32>
    %199 = vector.shape_cast %198 : vector<2x8x32xf32> to vector<16x32xf32>
    %cst_99 = arith.constant dense<0.000000e+00> : vector<16x32xf32>
    %200 = tpu.matmul %199, %1, %cst_99 {dimension_numbers = #tpu.dot_dimension_numbers<[1], [0], [0], [1], [0, 0, 1, 1], [], []>} : vector<16x32xf32>, vector<32x32xf32>, vector<16x32xf32> -> vector<16x32xf32>
    %201 = vector.shape_cast %200 : vector<16x32xf32> to vector<2x8x32xf32>
    %cst_100 = arith.constant dense<0xFF800000> : vector<2x32xf32>
    %202 = vector.multi_reduction <maximumf>, %201, %cst_100 [1] : vector<2x8x32xf32> to vector<2x32xf32>
    %203 = vector.shape_cast %202 : vector<2x32xf32> to vector<2x1x32xf32>
    %204 = vector.broadcast %203 : vector<2x1x32xf32> to vector<2x8x32xf32>
    %205 = arith.subf %201, %204 : vector<2x8x32xf32>
    %206 = math.exp %205 : vector<2x8x32xf32>
    %cst_101 = arith.constant dense<0.000000e+00> : vector<2x32xf32>
    %207 = vector.multi_reduction <add>, %206, %cst_101 [1] : vector<2x8x32xf32> to vector<2x32xf32>
    %208 = vector.shape_cast %207 : vector<2x32xf32> to vector<2x1x32xf32>
    %209 = vector.broadcast %208 : vector<2x1x32xf32> to vector<2x8x32xf32>
    %210 = arith.divf %206, %209 : vector<2x8x32xf32>
    %211 = vector.shape_cast %210 : vector<2x8x32xf32> to vector<16x32xf32>
    %cst_102 = arith.constant dense<0.000000e+00> : vector<16x32xf32>
    %212 = tpu.matmul %211, %3, %cst_102 {dimension_numbers = #tpu.dot_dimension_numbers<[1], [0], [0], [1], [0, 0, 1, 1], [], []>} : vector<16x32xf32>, vector<32x32xf32>, vector<16x32xf32> -> vector<16x32xf32>
    %213 = vector.shape_cast %212 : vector<16x32xf32> to vector<2x8x32xf32>
    %214 = arith.mulf %213, %32 : vector<2x8x32xf32>
    %cst_103 = arith.constant dense<0.000000e+00> : vector<2x32xf32>
    %215 = vector.multi_reduction <add>, %214, %cst_103 [1] : vector<2x8x32xf32> to vector<2x32xf32>
    %c9_104 = arith.constant 9 : index
    %c0_105 = arith.constant 0 : index
    %c0_106 = arith.constant 0 : index
    %216 = vector.load %arg2[%c9_104, %c0_105, %c0_106] : memref<13x32x32xf32, #tpu.memory_space<vmem>>, vector<1x32x32xf32>
    %217 = vector.shape_cast %216 : vector<1x32x32xf32> to vector<32x32xf32>
    %cst_107 = arith.constant dense<0.000000e+00> : vector<2x32xf32>
    %218 = tpu.matmul %215, %217, %cst_107 {dimension_numbers = #tpu.dot_dimension_numbers<[1], [0], [0], [1], [0, 0, 1, 1], [], []>} : vector<2x32xf32>, vector<32x32xf32>, vector<2x32xf32> -> vector<2x32xf32>
    %c16 = arith.constant 16 : index
    %c0_108 = arith.constant 0 : index
    %219 = vector.load %arg5[%c16, %c0_108] : memref<27x32xf32, #tpu.memory_space<vmem>>, vector<1x32xf32>
    %220 = vector.broadcast %219 : vector<1x32xf32> to vector<2x32xf32>
    %221 = arith.addf %218, %220 : vector<2x32xf32>
    %222 = arith.addf %189, %221 : vector<2x32xf32>
    %cst_109 = arith.constant dense<0.000000e+00> : vector<2xf32>
    %223 = vector.multi_reduction <add>, %222, %cst_109 [1] : vector<2x32xf32> to vector<2xf32>
    %224 = vector.shape_cast %223 : vector<2xf32> to vector<2x1xf32>
    %cst_110 = arith.constant 3.200000e+01 : f32
    %225 = vector.broadcast %cst_110 : f32 to vector<2x1xf32>
    %226 = arith.divf %224, %225 : vector<2x1xf32>
    %227 = arith.mulf %222, %222 : vector<2x32xf32>
    %cst_111 = arith.constant dense<0.000000e+00> : vector<2xf32>
    %228 = vector.multi_reduction <add>, %227, %cst_111 [1] : vector<2x32xf32> to vector<2xf32>
    %229 = vector.shape_cast %228 : vector<2xf32> to vector<2x1xf32>
    %cst_112 = arith.constant 3.200000e+01 : f32
    %230 = vector.broadcast %cst_112 : f32 to vector<2x1xf32>
    %231 = arith.divf %229, %230 : vector<2x1xf32>
    %232 = arith.mulf %226, %226 : vector<2x1xf32>
    %233 = arith.subf %231, %232 : vector<2x1xf32>
    %cst_113 = arith.constant 9.99999974E-6 : f32
    %234 = vector.broadcast %cst_113 : f32 to vector<2x1xf32>
    %235 = arith.addf %233, %234 : vector<2x1xf32>
    %236 = math.rsqrt %235 : vector<2x1xf32>
    %237 = vector.broadcast %226 : vector<2x1xf32> to vector<2x32xf32>
    %238 = arith.subf %222, %237 : vector<2x32xf32>
    %239 = vector.broadcast %236 : vector<2x1xf32> to vector<2x32xf32>
    %240 = arith.mulf %238, %239 : vector<2x32xf32>
    %c19 = arith.constant 19 : index
    %c0_114 = arith.constant 0 : index
    %241 = vector.load %arg5[%c19, %c0_114] : memref<27x32xf32, #tpu.memory_space<vmem>>, vector<1x32xf32>
    %242 = vector.broadcast %241 : vector<1x32xf32> to vector<2x32xf32>
    %243 = arith.mulf %240, %242 : vector<2x32xf32>
    %c20 = arith.constant 20 : index
    %c0_115 = arith.constant 0 : index
    %244 = vector.load %arg5[%c20, %c0_115] : memref<27x32xf32, #tpu.memory_space<vmem>>, vector<1x32xf32>
    %245 = vector.broadcast %244 : vector<1x32xf32> to vector<2x32xf32>
    %246 = arith.addf %243, %245 : vector<2x32xf32>
    %c1_116 = arith.constant 1 : index
    %c0_117 = arith.constant 0 : index
    %c0_118 = arith.constant 0 : index
    %247 = vector.load %arg3[%c1_116, %c0_117, %c0_118] : memref<3x32x128xf32, #tpu.memory_space<vmem>>, vector<1x32x128xf32>
    %248 = vector.shape_cast %247 : vector<1x32x128xf32> to vector<32x128xf32>
    %cst_119 = arith.constant dense<0.000000e+00> : vector<2x128xf32>
    %249 = tpu.matmul %246, %248, %cst_119 {dimension_numbers = #tpu.dot_dimension_numbers<[1], [0], [0], [1], [0, 0, 1, 1], [], []>} : vector<2x32xf32>, vector<32x128xf32>, vector<2x128xf32> -> vector<2x128xf32>
    %c1_120 = arith.constant 1 : index
    %c0_121 = arith.constant 0 : index
    %250 = vector.load %arg6[%c1_120, %c0_121] : memref<3x128xf32, #tpu.memory_space<vmem>>, vector<1x128xf32>
    %251 = vector.broadcast %250 : vector<1x128xf32> to vector<2x128xf32>
    %252 = arith.addf %249, %251 : vector<2x128xf32>
    %cst_122 = arith.constant 0.000000e+00 : f32
    %253 = vector.broadcast %cst_122 : f32 to vector<2x128xf32>
    %254 = arith.maximumf %252, %253 : vector<2x128xf32>
    %c1_123 = arith.constant 1 : index
    %c0_124 = arith.constant 0 : index
    %c0_125 = arith.constant 0 : index
    %255 = vector.load %arg4[%c1_123, %c0_124, %c0_125] : memref<2x128x32xf32, #tpu.memory_space<vmem>>, vector<1x128x32xf32>
    %256 = vector.shape_cast %255 : vector<1x128x32xf32> to vector<128x32xf32>
    %cst_126 = arith.constant dense<0.000000e+00> : vector<2x32xf32>
    %257 = tpu.matmul %254, %256, %cst_126 {dimension_numbers = #tpu.dot_dimension_numbers<[1], [0], [0], [1], [0, 0, 1, 1], [], []>} : vector<2x128xf32>, vector<128x32xf32>, vector<2x32xf32> -> vector<2x32xf32>
    %c23 = arith.constant 23 : index
    %c0_127 = arith.constant 0 : index
    %258 = vector.load %arg5[%c23, %c0_127] : memref<27x32xf32, #tpu.memory_space<vmem>>, vector<1x32xf32>
    %259 = vector.broadcast %258 : vector<1x32xf32> to vector<2x32xf32>
    %260 = arith.addf %257, %259 : vector<2x32xf32>
    %261 = arith.addf %246, %260 : vector<2x32xf32>
    %cst_128 = arith.constant dense<0.000000e+00> : vector<2xf32>
    %262 = vector.multi_reduction <add>, %261, %cst_128 [1] : vector<2x32xf32> to vector<2xf32>
    %263 = vector.shape_cast %262 : vector<2xf32> to vector<2x1xf32>
    %cst_129 = arith.constant 3.200000e+01 : f32
    %264 = vector.broadcast %cst_129 : f32 to vector<2x1xf32>
    %265 = arith.divf %263, %264 : vector<2x1xf32>
    %266 = arith.mulf %261, %261 : vector<2x32xf32>
    %cst_130 = arith.constant dense<0.000000e+00> : vector<2xf32>
    %267 = vector.multi_reduction <add>, %266, %cst_130 [1] : vector<2x32xf32> to vector<2xf32>
    %268 = vector.shape_cast %267 : vector<2xf32> to vector<2x1xf32>
    %cst_131 = arith.constant 3.200000e+01 : f32
    %269 = vector.broadcast %cst_131 : f32 to vector<2x1xf32>
    %270 = arith.divf %268, %269 : vector<2x1xf32>
    %271 = arith.mulf %265, %265 : vector<2x1xf32>
    %272 = arith.subf %270, %271 : vector<2x1xf32>
    %cst_132 = arith.constant 9.99999974E-6 : f32
    %273 = vector.broadcast %cst_132 : f32 to vector<2x1xf32>
    %274 = arith.addf %272, %273 : vector<2x1xf32>
    %275 = math.rsqrt %274 : vector<2x1xf32>
    %276 = vector.broadcast %265 : vector<2x1xf32> to vector<2x32xf32>
    %277 = arith.subf %261, %276 : vector<2x32xf32>
    %278 = vector.broadcast %275 : vector<2x1xf32> to vector<2x32xf32>
    %279 = arith.mulf %277, %278 : vector<2x32xf32>
    %c21 = arith.constant 21 : index
    %c0_133 = arith.constant 0 : index
    %280 = vector.load %arg5[%c21, %c0_133] : memref<27x32xf32, #tpu.memory_space<vmem>>, vector<1x32xf32>
    %281 = vector.broadcast %280 : vector<1x32xf32> to vector<2x32xf32>
    %282 = arith.mulf %279, %281 : vector<2x32xf32>
    %c22 = arith.constant 22 : index
    %c0_134 = arith.constant 0 : index
    %283 = vector.load %arg5[%c22, %c0_134] : memref<27x32xf32, #tpu.memory_space<vmem>>, vector<1x32xf32>
    %284 = vector.broadcast %283 : vector<1x32xf32> to vector<2x32xf32>
    %285 = arith.addf %282, %284 : vector<2x32xf32>
    %cst_135 = arith.constant dense<0.000000e+00> : vector<2xf32>
    %286 = vector.multi_reduction <add>, %285, %cst_135 [1] : vector<2x32xf32> to vector<2xf32>
    %287 = vector.shape_cast %286 : vector<2xf32> to vector<2x1xf32>
    %cst_136 = arith.constant 3.200000e+01 : f32
    %288 = vector.broadcast %cst_136 : f32 to vector<2x1xf32>
    %289 = arith.divf %287, %288 : vector<2x1xf32>
    %290 = arith.mulf %285, %285 : vector<2x32xf32>
    %cst_137 = arith.constant dense<0.000000e+00> : vector<2xf32>
    %291 = vector.multi_reduction <add>, %290, %cst_137 [1] : vector<2x32xf32> to vector<2xf32>
    %292 = vector.shape_cast %291 : vector<2xf32> to vector<2x1xf32>
    %cst_138 = arith.constant 3.200000e+01 : f32
    %293 = vector.broadcast %cst_138 : f32 to vector<2x1xf32>
    %294 = arith.divf %292, %293 : vector<2x1xf32>
    %295 = arith.mulf %289, %289 : vector<2x1xf32>
    %296 = arith.subf %294, %295 : vector<2x1xf32>
    %cst_139 = arith.constant 9.99999974E-6 : f32
    %297 = vector.broadcast %cst_139 : f32 to vector<2x1xf32>
    %298 = arith.addf %296, %297 : vector<2x1xf32>
    %299 = math.rsqrt %298 : vector<2x1xf32>
    %300 = vector.broadcast %289 : vector<2x1xf32> to vector<2x32xf32>
    %301 = arith.subf %285, %300 : vector<2x32xf32>
    %302 = vector.broadcast %299 : vector<2x1xf32> to vector<2x32xf32>
    %303 = arith.mulf %301, %302 : vector<2x32xf32>
    %c24 = arith.constant 24 : index
    %c0_140 = arith.constant 0 : index
    %304 = vector.load %arg5[%c24, %c0_140] : memref<27x32xf32, #tpu.memory_space<vmem>>, vector<1x32xf32>
    %305 = vector.broadcast %304 : vector<1x32xf32> to vector<2x32xf32>
    %306 = arith.mulf %303, %305 : vector<2x32xf32>
    %c25 = arith.constant 25 : index
    %c0_141 = arith.constant 0 : index
    %307 = vector.load %arg5[%c25, %c0_141] : memref<27x32xf32, #tpu.memory_space<vmem>>, vector<1x32xf32>
    %308 = vector.broadcast %307 : vector<1x32xf32> to vector<2x32xf32>
    %309 = arith.addf %306, %308 : vector<2x32xf32>
    %c10_142 = arith.constant 10 : index
    %c0_143 = arith.constant 0 : index
    %c0_144 = arith.constant 0 : index
    %310 = vector.load %arg2[%c10_142, %c0_143, %c0_144] : memref<13x32x32xf32, #tpu.memory_space<vmem>>, vector<1x32x32xf32>
    %311 = vector.shape_cast %310 : vector<1x32x32xf32> to vector<32x32xf32>
    %cst_145 = arith.constant dense<0.000000e+00> : vector<2x32xf32>
    %312 = tpu.matmul %309, %311, %cst_145 {dimension_numbers = #tpu.dot_dimension_numbers<[1], [0], [0], [1], [0, 0, 1, 1], [], []>} : vector<2x32xf32>, vector<32x32xf32>, vector<2x32xf32> -> vector<2x32xf32>
    %c26 = arith.constant 26 : index
    %c0_146 = arith.constant 0 : index
    %313 = vector.load %arg5[%c26, %c0_146] : memref<27x32xf32, #tpu.memory_space<vmem>>, vector<1x32xf32>
    %314 = vector.broadcast %313 : vector<1x32xf32> to vector<2x32xf32>
    %315 = arith.addf %312, %314 : vector<2x32xf32>
    %cst_147 = arith.constant 0.000000e+00 : f32
    %316 = vector.broadcast %cst_147 : f32 to vector<2x32xf32>
    %317 = arith.maximumf %315, %316 : vector<2x32xf32>
    %c2_148 = arith.constant 2 : index
    %c0_149 = arith.constant 0 : index
    %c0_150 = arith.constant 0 : index
    %318 = vector.load %arg3[%c2_148, %c0_149, %c0_150] : memref<3x32x128xf32, #tpu.memory_space<vmem>>, vector<1x32x128xf32>
    %319 = vector.shape_cast %318 : vector<1x32x128xf32> to vector<32x128xf32>
    %cst_151 = arith.constant dense<0.000000e+00> : vector<2x128xf32>
    %320 = tpu.matmul %317, %319, %cst_151 {dimension_numbers = #tpu.dot_dimension_numbers<[1], [0], [0], [1], [0, 0, 1, 1], [], []>} : vector<2x32xf32>, vector<32x128xf32>, vector<2x128xf32> -> vector<2x128xf32>
    %c2_152 = arith.constant 2 : index
    %c0_153 = arith.constant 0 : index
    %321 = vector.load %arg6[%c2_152, %c0_153] : memref<3x128xf32, #tpu.memory_space<vmem>>, vector<1x128xf32>
    %322 = vector.broadcast %321 : vector<1x128xf32> to vector<2x128xf32>
    %323 = arith.addf %320, %322 : vector<2x128xf32>
    %c0_154 = arith.constant 0 : index
    %c0_155 = arith.constant 0 : index
    %324 = vector.load %arg7[%c0_154, %c0_155] : memref<2x128xf32, #tpu.memory_space<vmem>>, vector<2x128xf32>
    tpu.vector_store %arg7[%c0_154, %c0_155], %323 {strides = array<i32>} : memref<2x128xf32, #tpu.memory_space<vmem>>, vector<2x128xf32>,
    return
  }
}

</mosaic_0001>

<bundles_post_ra>
// kernel: residual_estimation_forward.1
= control target key start
LH: loop header
LB: loop body
LE: loop exit
PB: predicated region body
PF: predicated region fallthrough
CT: control target
= control target key end

     0   :  { %vm49_vm0 = vcmask 261120   ;;  %s3523_s0 = inlined_call_operand.vmem [shape: f32[2,32], index: 0, kind: input, shape index: {}]   ;;  %s3524_s1 = inlined_call_operand.vmem [shape: f32[16,32], index: 1, kind: input, shape index: {}]   ;;  %s3525_s2 = inlined_call_operand.vmem [shape: f32[13,32,32], index: 2, kind: input, shape index: {}]   ;;  %s3526_s3 = inlined_call_operand.vmem [shape: f32[3,32,128], index: 3, kind: input, shape index: {}]   ;;  %s3527_s4 = inlined_call_operand.vmem [shape: f32[2,128,32], index: 4, kind: input, shape index: {}]   ;;  %s3528_s5 = inlined_call_operand.vmem [shape: f32[27,32], index: 5, kind: input, shape index: {}]   ;;  %s3529_s6 = inlined_call_operand.vmem [shape: f32[3,128], index: 6, kind: input, shape index: {}]   ;;  %s3530_s7 = inlined_call_operand.hbm [shape: f32[2,128], index: 7, kind: output, shape index: {}]  }
   0x1   :  { %v2140_v0 = vld [vmem:[%s3525_s2 + $0xe0] sm:$0xff]  ;;  %v2141_v1 = vld [vmem:[%s3525_s2 + $0xe8] sm:$0xff]  ;;  %v2142_v2 = vld [vmem:[%s3525_s2 + $0xf0] sm:$0xff] }
   0x2   :  { %v2662_v3 = vpack.c.bf16 %v2141_v1, %v2140_v0  ;;  %v2143_v4 = vld [vmem:[%s3525_s2 + $0xf8] sm:$0xff]  ;;  %v2937_v5 = vld [vmem:[%s3524_s1] sm:$0xff] }
   0x3   :  { %v2666_v6 = vpack.c.bf16 %v2143_v4, %v2142_v2  ;;  %2408 = vmatprep.mubr.msk.f32.mxu0 %vm49_vm0, %v2937_v5  ;;  %2386 = vmatprep.mubr.msk.f32.mxu1 %vm49_vm0, %v2937_v5 }
   0x4   :  { %2663 = vmatprep.subr.bf16.mxu0 %v2662_v3 }
   0x5   :  { %12 = vsyncpa [#allocation3], 0  ;;  %2665 = vmatpush3.bf16.msra.mxu0 %v2662_v3  ;;  %v387_v7 = vld [vmem:[%s3525_s2] sm:$0xff]  ;;  %v388_v8 = vld [vmem:[%s3525_s2 + $0x8] sm:$0xff]  ;;  %v2877_v11 = vmov 0.0|0.0   ;;  %vm2878_vm1 = vmmov 0  }
   0x6   :  { %2667 = vmatprep.subr.bf16.mxu0 %v2666_v6  ;;  %v2952_v9 = vld [vmem:[%s3524_s1 + $0x8] sm:$0xff]  ;;  %v2679_v10 = vpack.c.bf16 %v388_v8, %v387_v7  ;;  %v389_v12 = vld [vmem:[%s3525_s2 + $0x10] sm:$0xff]  ;;  %v390_v13 = vld [vmem:[%s3525_s2 + $0x18] sm:$0xff]  ;;  %v2879_v15 = vmov 0.0   ;;  %vm469_vm2 = vcmask 254976   ;;  %vm844_vm3 = vcmask 1041409  }
   0x7   :  { %v2682_v14 = vpack.c.bf16 %v390_v13, %v389_v12  ;;  %v386_v16 = vld [vmem:[%s3523_s0] sm:$0x3]  ;;  %v2127_v18 = vld [vmem:[%s3525_s2 + $0x48] sm:$0xff]  ;;  %v2128_v19 = vld [vmem:[%s3525_s2 + $0x50] sm:$0xff]  ;;  %v2880_v13 = vmov 1966171168  }
   0x8   :  { %v2126_v17 = vld [vmem:[%s3525_s2 + $0x40] sm:$0xff]  ;;  %v2129_v21 = vld [vmem:[%s3525_s2 + $0x58] sm:$0xff]  ;;  %v2134_v33 = vld [vmem:[%s3525_s2 + $0x68] sm:$0xff]  ;;  %s2881_s0 = smov [#allocation2]  }
   0x9   :  { %2669 = vmatpush3.bf16.msra.mxu0 %v2666_v6  ;;  %v2646_v20 = vpack.c.bf16 %v2127_v18, %v2126_v17  ;;  %v2650_v22 = vpack.c.bf16 %v2129_v21, %v2128_v19  ;;  %v2154_v25 = vld [vmem:[%s3528_s5] ss:$0 sm:$0xff]  ;;  %v2135_v35 = vld [vmem:[%s3525_s2 + $0x70] sm:$0xff]  ;;  %v2136_v36 = vld [vmem:[%s3525_s2 + $0x78] sm:$0xff]  ;;  %s2110_s30 = sshll.u32 %s2881_s0, 4  ;;  %s2111_s30 = int_to_ptr.vmem [resolvable:$true] %s2110_s30 }
   0xa   :  { %2678 = vmatprep.subr.bf16.mxu0 %v2877_v11  ;;  %v2133_v32 = vld [vmem:[%s3525_s2 + $0x60] sm:$0xff]  ;;  %v2658_v37 = vpack.c.bf16 %v2136_v36, %v2135_v35  ;;  %v2148_v39 = vld [vmem:[%s3525_s2 + $0x108] sm:$0xff]  ;;  %v2149_v41 = vld [vmem:[%s3525_s2 + $0x110] sm:$0xff]  ;;  %p2858_p1 = scmp.lt.s32.totalorder %s2111_s30, %s2111_s30 }
   0xb   :  { %2647 = vmatprep.subr.bf16.mxu1 %v2646_v20  ;;  %v2654_v34 = vpack.c.bf16 %v2134_v33, %v2133_v32  ;;  %v2147_v38 = vld [vmem:[%s3525_s2 + $0x100] sm:$0xff]  ;;  %v2150_v42 = vld [vmem:[%s3525_s2 + $0x118] sm:$0xff]  ;;  %v2159_v45 = vld [vmem:[%s3525_s2 + $0x28] sm:$0xff] }
   0xc   :  { %2409 = vmatmul.mubr.msk.f32.vlgmr.msra.gmra.mrb[0].mxu0 %vm49_vm0, %v2952_v9  ;;  %2649 = vmatpush3.bf16.msra.mxu1 %v2646_v20  ;;  %v2670_v40 = vpack.c.bf16 %v2148_v39, %v2147_v38  ;;  %v2674_v43 = vpack.c.bf16 %v2150_v42, %v2149_v41  ;;  %v2158_v44 = vld [vmem:[%s3525_s2 + $0x20] sm:$0xff]  ;;  %v2160_v47 = vld [vmem:[%s3525_s2 + $0x30] sm:$0xff]  ;;  %v2161_v48 = vld [vmem:[%s3525_s2 + $0x38] sm:$0xff] }
   0xd   :  { %2680 = vmatpush3.bf16.msra.mxu0 %v2679_v10  ;;  %2430 = vmatprep.mubr.msk.f32.mxu0 %vm2878_vm1, %v2879_v15  ;;  %v2685_v46 = vpack.c.bf16 %v2159_v45, %v2158_v44  ;;  %v2688_v49 = vpack.c.bf16 %v2161_v48, %v2160_v47  ;;  %v2156_v61 = vld [vmem:[%s3528_s5 + $0x5] ss:$0 sm:$0xff]  ;;  %v2157_v63 = vld [vmem:[%s3528_s5 + $0x6] ss:$0 sm:$0xff]  ;;  %v2119_v7 = vld [vmem:[%s3525_s2 + $0x168] sm:$0xff] }
   0xe   :  { %2681 = vmatprep.subr.bf16.mxu0 %v2877_v11  ;;  %2651 = vmatprep.subr.bf16.mxu1 %v2650_v22  ;;  %v2118_v6 = vld [vmem:[%s3525_s2 + $0x160] sm:$0xff]  ;;  %v2121_v10 = vld [vmem:[%s3525_s2 + $0x178] sm:$0xff]  ;;  %v2123_v39 = vld [vmem:[%s3525_s2 + $0x188] sm:$0xff] }
   0xf   :  { %v3065_v8 = vpack.c.bf16 %v2119_v7, %v2118_v6  ;;  %v2162_v19 = vld [vmem:[%s3528_s5 + $0x1] ss:$0 sm:$0xff]  ;;  %v2125_v42 = vld [vmem:[%s3525_s2 + $0x198] sm:$0xff] }
  0x10   :  { %2653 = vmatpush3.bf16.msra.mxu1 %v2650_v22  ;;  %v2122_v38 = vld [vmem:[%s3525_s2 + $0x180] sm:$0xff] }
  0x11   :  { %2683 = vmatpush3.bf16.msra.mxu0 %v2682_v14  ;;  %2655 = vmatprep.subr.bf16.mxu1 %v2654_v34  ;;  %v583_v14 = vunpack.c.l.s4 %v2880_v13  ;;  %v3108_v41 = vpack.c.bf16 %v2123_v39, %v2122_v38  ;;  %v2137_v39 = vld [vmem:[%s3528_s5 + $0x3] ss:$0 sm:$0xff] }
  0x12   :  { %2691 = vmatprep.subr.bf16.mxu0 %v3065_v8 }
  0x13   :  { %2387 = vmatmul.mubr.msk.f32.vlgmr.msra.gmra.mrb[0].mxu1 %vm49_vm0, %v2952_v9  ;;  %v584_v17 = vunpack.c.0.s8 %v583_v14 }
  0x14   :  { %2431 = vmatmul.mubr.msk.f32.vlgmr.msra.gmra.mrb[2].mxu0 %vm49_vm0, %v386_v16  ;;  %2397 = vmatprep.mubr.msk.f32.mxu1 %vm49_vm0, %v2937_v5  ;;  %v585_v16 = vlaneseq }
  0x15   :  { %2657 = vmatpush3.bf16.msra.mxu1 %v2654_v34  ;;  %2693 = vmatpush3.bf16.msra.mxu0 %v3065_v8 }
  0x16   :  { %2659 = vmatprep.subr.bf16.mxu1 %v2658_v37  ;;  %v586_v18 = vshrl.u32 %v585_v16, 7 }
  0x18   :  { %v3083_v20 = vsub.s32 %v584_v17, %v586_v18 }
  0x19   :  { %2661 = vmatpush3.bf16.msra.mxu1 %v2658_v37 }
  0x1a   :  { %2671 = vmatprep.subr.bf16.mxu1 %v2670_v40 }
  0x1c   :  { %2398 = vmatmul.mubr.msk.f32.vlgmr.msra.gmra.mrb[2].mxu1 %vm49_vm0, %v2952_v9 }
  0x1d   :  { %2673 = vmatpush3.bf16.msra.mxu1 %v2670_v40  ;;  %2419 = vmatprep.mubr.msk.f32.mxu1 %vm49_vm0, %v2937_v5  ;;  %v2124_v40 = vld [vmem:[%s3525_s2 + $0x190] sm:$0xff] }
  0x1e   :  { %2675 = vmatprep.subr.bf16.mxu1 %v2674_v43 }
  0x21   :  { %2677 = vmatpush3.bf16.msra.mxu1 %v2674_v43  ;;  %v3113_v43 = vpack.c.bf16 %v2125_v42, %v2124_v40 }
  0x22   :  { %2684 = vmatprep.subr.bf16.mxu1 %v2877_v11 }
  0x24   :  { %2420 = vmatmul.mubr.msk.f32.vlgmr.msra.gmra.mrb[4].mxu1 %vm49_vm0, %v2952_v9  ;;  %v2120_v9 = vld [vmem:[%s3525_s2 + $0x170] sm:$0xff] }
  0x25   :  { %2686 = vmatpush3.bf16.msra.mxu1 %v2685_v46  ;;  %2441 = vmatprep.mubr.msk.f32.mxu1 %vm2878_vm1, %v2879_v15  ;;  %v3075_v12 = vpack.c.bf16 %v2121_v10, %v2120_v9 }
  0x26   :  { %2687 = vmatprep.subr.bf16.mxu1 %v2877_v11 }
  0x27   :  { %2695 = vmatprep.subr.bf16.mxu0 %v3075_v12 }
  0x28   :  { %2697 = vmatpush3.bf16.msra.mxu0 %v3075_v12 }
  0x29   :  { %2689 = vmatpush3.bf16.msra.mxu1 %v2688_v49  ;;  %2706 = vmatprep.subr.bf16.mxu0 %v2877_v11 }
  0x2a   :  { %2699 = vmatprep.subr.bf16.mxu1 %v3108_v41 }
  0xdf   :  { %v2986_v23 = vpop.f32.mrb[0].mxu0 }
  0xe0   :  { %v2988_v24 = vpop.f32.mrb[1].mxu0 }
  0xe6   :  { %v2388_v50 = vpop.f32.mrb[0].mxu1 }
  0xe7   :  { %v465_v26 = vpop.f32.mrb[2].mxu0  ;;  %v122_v51 = vpop.f32.mrb[1].mxu1 }
  0xe8   :  { %v466_v27 = vadd.f32 %v2154_v25, %v465_v26  ;;  %v2432_v28 = vpop.f32.mrb[3].mxu0 }
  0xe9   :  { %v2130_v28 = vld [vmem:[%s3528_s5 + $0x2] ss:$0 sm:$0xff] }
  0xea   :  { %v470_v29 = vsel %vm469_vm2, %v466_v27, 0.0  ;;  %v475_v30 = vmul.f32 %v466_v27, %v466_v27  ;;  %v128_v34 = vadd.f32 %v2388_v50, %v2130_v28 }
  0xeb   :  { %471 = vadd.xlane.f32.xlu0 %v470_v29 }
  0xec   :  { %v476_v31 = vsel %vm469_vm2, %v475_v30, 0.0 }
  0xef   :  { %477 = vadd.xlane.f32.xlu0 %v476_v31  ;;  %v3051_v2 = vpop.f32.mrb[2].mxu1  ;;  %v123_v31 = vadd.f32 %v2130_v28, %v122_v51 }
  0xf0   :  { %v3053_v3 = vpop.f32.mrb[3].mxu1  ;;  %v213_v40 = vadd.f32 %v3051_v2, %v2137_v39 }
  0xf1   :  { %v208_v42 = vadd.f32 %v2137_v39, %v3053_v3  ;;  %v1040_v39 = vld [vmem:[%s3527_s4 + $0x58] sm:$0xff] }
  0xf7   :  { %v3055_v4 = vpop.f32.mrb[4].mxu1 }
  0xf8   :  { %v3057_v5 = vpop.f32.mrb[5].mxu1 }
 0x178   :  { %v472_v52 = vpop.xlane.xlu0 %471 }
 0x179   :  { %v474_v53 = vmul.f32 0.03125, %v472_v52 }
 0x17b   :  { %v480_v55 = vmul.f32 %v474_v53, %v474_v53  ;;  %v484_v59 = vsub.f32 %v466_v27, %v474_v53  ;;  %v3086_v27 = vsub.s32 0, %v586_v18 }
 0x17c   :  { %v478_v54 = vpop.xlane.xlu0 %477 }
 0x17d   :  { %v479_v56 = vmul.f32 0.03125, %v478_v54 }
 0x17f   :  { %v481_v57 = vsub.f32 %v479_v56, %v480_v55 }
 0x181   :  { %v482_v58 = vadd.f32 1e-05, %v481_v57 }
 0x183   :  { %2823 = vrsqrt.f32 %v482_v58 }
 0x18d   :  { %v2824_v60 = vpop.eup %2823 }
 0x18e   :  { %v485_v62 = vmul.f32 %v2824_v60, %v484_v59 }
 0x190   :  { %v491_v0 = vmul.f32 %v2156_v61, %v485_v62 }
 0x192   :  { %v3047_v1 = vadd.f32 %v2157_v63, %v491_v0 }
 0x194   :  { %2442 = vmatmul.mubr.msk.f32.vlgmr.msra.gmra.mrb[6].mxu1 %vm49_vm0, %v3047_v1 }
 0x195   :  { %2701 = vmatpush3.bf16.msra.mxu1 %v3108_v41 }
 0x196   :  { %2703 = vmatprep.subr.bf16.mxu1 %v3113_v43 }
 0x199   :  { %2705 = vmatpush3.bf16.msra.mxu1 %v3113_v43 }
 0x19a   :  { %2712 = vmatprep.subr.bf16.mxu1 %v2877_v11 }
 0x267   :  { %v577_v21 = vpop.f32.mrb[6].mxu1 }
 0x268   :  { %v578_v22 = vadd.f32 %v2162_v19, %v577_v21  ;;  %v2443_v25 = vpop.f32.mrb[7].mxu1 }
 0x26a   :  { %v588_v26 = vrot.slane %v578_v22, %v3083_v20 }
 0x26c   :  { %v589_v29 = vcombine.high %v588_v26, %v588_v26  ;;  %v596_v30 = vrot.slane %v588_v26, %v3083_v20 }
 0x26e   :  { %v603_v32 = vrot.slane %v589_v29, %v3083_v20  ;;  %v607_v33 = vrot.slane %v596_v30, %v3086_v27 }
 0x270   :  { %v611_v35 = vrot.slane %v603_v32, %v3086_v27  ;;  %v614_v36 = vmul.f32 %v607_v33, %v123_v31  ;;  %v2168_v33 = vld [vmem:[%s3525_s2 + $0x80] sm:$0xff] }
 0x272   :  { %v615_v37 = vmul.f32 %v611_v35, %v128_v34  ;;  %2452 = vmatprep.mubr.msk.f32.mxu0 %vm49_vm0, %v614_v36  ;;  %v2169_v34 = vld [vmem:[%s3525_s2 + $0x88] sm:$0xff]  ;;  %v2170_v36 = vld [vmem:[%s3525_s2 + $0x90] sm:$0xff] }
 0x273   :  { %v2707_v35 = vpack.c.bf16 %v2169_v34, %v2168_v33  ;;  %v1036_v33 = vld [vmem:[%s3527_s4 + $0x38] sm:$0xff] }
 0x274   :  { %2453 = vmatmul.mubr.msk.f32.vlgmr.msra.gmra.mrb[4].mxu0 %vm49_vm0, %v615_v37  ;;  %v2171_v37 = vld [vmem:[%s3525_s2 + $0x98] sm:$0xff] }
 0x275   :  { %2474 = vmatprep.mubr.msk.f32.mxu0 %vm2878_vm1, %v2879_v15  ;;  %2708 = vmatpush3.bf16.msra.mxu0 %v2707_v35  ;;  %v2710_v38 = vpack.c.bf16 %v2171_v37, %v2170_v36  ;;  %v1037_v35 = vld [vmem:[%s3527_s4 + $0x40] sm:$0xff]  ;;  %v1038_v36 = vld [vmem:[%s3527_s4 + $0x48] sm:$0xff] }
 0x276   :  { %2709 = vmatprep.subr.bf16.mxu0 %v2877_v11  ;;  %v2731_v37 = vpack.c.bf16 %v1038_v36, %v1037_v35 }
 0x279   :  { %2711 = vmatpush3.bf16.msra.mxu0 %v2710_v38  ;;  %v1039_v38 = vld [vmem:[%s3527_s4 + $0x50] sm:$0xff] }
 0x27a   :  { %2718 = vmatprep.subr.bf16.mxu0 %v2877_v11 }
 0x347   :  { %v2454_v44 = vpop.f32.mrb[4].mxu0 }
 0x348   :  { %v704_v45 = vsel %vm49_vm0, %v2454_v44, -inf  ;;  %v688_v46 = vpop.f32.mrb[5].mxu0 }
 0x349   :  { %v705_v47 = vrot.slane %v704_v45, 4  ;;  %v697_v48 = vsel %vm49_vm0, %v688_v46, -inf }
 0x34a   :  { %v698_v49 = vrot.slane %v697_v48, 4 }
 0x34b   :  { %v706_v50 = vmax.f32 %v704_v45, %v705_v47 }
 0x34c   :  { %v699_v51 = vmax.f32 %v697_v48, %v698_v49 }
 0x34d   :  { %v707_v52 = vrot.slane %v706_v50, 2 }
 0x34e   :  { %v700_v53 = vrot.slane %v699_v51, 2 }
 0x34f   :  { %v708_v54 = vmax.f32 %v706_v50, %v707_v52 }
 0x350   :  { %v701_v55 = vmax.f32 %v699_v51, %v700_v53 }
 0x351   :  { %v709_v56 = vrot.slane %v708_v54, 1 }
 0x352   :  { %v702_v57 = vrot.slane %v701_v55, 1 }
 0x353   :  { %v710_v58 = vmax.f32 %v708_v54, %v709_v56 }
 0x354   :  { %v703_v59 = vmax.f32 %v701_v55, %v702_v57 }
 0x355   :  { %v712_v60 = vsub.f32 %v2454_v44, %v710_v58 }
 0x356   :  { %v711_v61 = vsub.f32 %v688_v46, %v703_v59 }
 0x357   :  { %v715_v62 = vmul.f32 1.442695, %v712_v60 }
 0x358   :  { %v713_v63 = vmul.f32 1.442695, %v711_v61  ;;  %v2172_v61 = vld [vmem:[%s3528_s5 + $0x4] ss:$0 sm:$0xff] }
 0x359   :  { %2825 = vpow2.f32 %v715_v62 }
 0x35a   :  { %2827 = vpow2.f32 %v713_v63 }
 0x363   :  { %v2826_v0 = vpop.eup %2825 }
 0x364   :  { %v2828_v6 = vpop.eup %2827  ;;  %v724_v7 = vsel %vm49_vm0, %v2826_v0, 0.0 }
 0x365   :  { %v725_v9 = vrot.slane %v724_v7, 4  ;;  %v717_v10 = vsel %vm49_vm0, %v2828_v6, 0.0 }
 0x366   :  { %v718_v13 = vrot.slane %v717_v10, 4 }
 0x367   :  { %v726_v14 = vadd.f32 %v725_v9, %v724_v7 }
 0x368   :  { %v719_v16 = vadd.f32 %v718_v13, %v717_v10  ;;  %v946_v13 = vld [vmem:[%s3526_s3] sm:$0xff] }
 0x369   :  { %v727_v17 = vrot.slane %v726_v14, 2 }
 0x36a   :  { %v720_v18 = vrot.slane %v719_v16, 2 }
 0x36b   :  { %v728_v19 = vadd.f32 %v727_v17, %v726_v14  ;;  %v947_v14 = vld [vmem:[%s3526_s3 + $0x8] sm:$0xff]  ;;  %v949_v17 = vld [vmem:[%s3526_s3 + $0x18] sm:$0xff] }
 0x36c   :  { %v721_v21 = vadd.f32 %v720_v18, %v719_v16  ;;  %v948_v16 = vld [vmem:[%s3526_s3 + $0x10] sm:$0xff] }
 0x36d   :  { %v729_v22 = vrot.slane %v728_v19, 1  ;;  %v2716_v18 = vpack.c.bf16 %v949_v17, %v948_v16 }
 0x36e   :  { %v722_v25 = vrot.slane %v721_v21, 1 }
 0x36f   :  { %v730_v26 = vadd.f32 %v729_v22, %v728_v19  ;;  %v1029_v19 = vld [vmem:[%s3527_s4] sm:$0xff]  ;;  %v1031_v22 = vld [vmem:[%s3527_s4 + $0x10] sm:$0xff] }
 0x370   :  { %v723_v28 = vadd.f32 %v722_v25, %v721_v21  ;;  %v1030_v21 = vld [vmem:[%s3527_s4 + $0x8] sm:$0xff] }
 0x371   :  { %2829 = vrcp.f32 %v730_v26  ;;  %v2719_v25 = vpack.c.bf16 %v1030_v21, %v1029_v19  ;;  %v1032_v26 = vld [vmem:[%s3527_s4 + $0x18] sm:$0xff]  ;;  %v2182_v19 = vld [vmem:[%s3525_s2 + $0xa8] sm:$0xff] }
 0x372   :  { %2831 = vrcp.f32 %v723_v28  ;;  %v2722_v28 = vpack.c.bf16 %v1032_v26, %v1031_v22  ;;  %v2183_v22 = vld [vmem:[%s3525_s2 + $0xb0] sm:$0xff] }
 0x37b   :  { %v2830_v29 = vpop.eup %2829 }
 0x37c   :  { %v2832_v30 = vpop.eup %2831  ;;  %v734_v32 = vmul.f32 %v2830_v29, %v2826_v0  ;;  %v1033_v29 = vld [vmem:[%s3527_s4 + $0x20] sm:$0xff] }
 0x37d   :  { %v732_v31 = vmul.f32 %v2832_v30, %v2828_v6  ;;  %v1034_v30 = vld [vmem:[%s3527_s4 + $0x28] sm:$0xff] }
 0x37f   :  { %2463 = vmatprep.mubr.msk.f32.mxu1 %vm49_vm0, %v732_v31  ;;  %v2725_v31 = vpack.c.bf16 %v1034_v30, %v1033_v29 }
 0x380   :  { %2464 = vmatmul.mubr.msk.f32.vlgmr.msra.gmra.mrb[8].mxu1 %vm49_vm0, %v734_v32  ;;  %v1035_v32 = vld [vmem:[%s3527_s4 + $0x30] sm:$0xff] }
 0x381   :  { %2485 = vmatprep.mubr.msk.f32.mxu1 %vm2878_vm1, %v2879_v15  ;;  %v2728_v34 = vpack.c.bf16 %v1036_v33, %v1035_v32 }
 0x453   :  { %v2465_v44 = vpop.f32.mrb[8].mxu1 }
 0x454   :  { %v817_v45 = vmul.f32 %v2465_v44, %v213_v40  ;;  %v807_v46 = vpop.f32.mrb[9].mxu1  ;;  %v2734_v40 = vpack.c.bf16 %v1040_v39, %v1039_v38  ;;  %v1042_v44 = vld [vmem:[%s3527_s4 + $0x68] sm:$0xff] }
 0x455   :  { %v816_v47 = vmul.f32 %v807_v46, %v208_v42  ;;  %v1041_v42 = vld [vmem:[%s3527_s4 + $0x60] sm:$0xff]  ;;  %v2180_v39 = vld [vmem:[%s3528_s5 + $0xa] ss:$0 sm:$0xff] }
 0x456   :  { %v825_v48 = vsel %vm49_vm0, %v817_v45, 0.0  ;;  %v2737_v45 = vpack.c.bf16 %v1042_v44, %v1041_v42  ;;  %v2185_v44 = vld [vmem:[%s3528_s5 + $0xc] ss:$0 sm:$0xff] }
 0x457   :  { %v826_v49 = vrot.slane %v825_v48, 4  ;;  %v818_v50 = vsel %vm49_vm0, %v816_v47, 0.0 }
 0x458   :  { %v819_v51 = vrot.slane %v818_v50, 4 }
 0x459   :  { %v827_v52 = vadd.f32 %v826_v49, %v825_v48 }
 0x45a   :  { %v820_v53 = vadd.f32 %v819_v51, %v818_v50 }
 0x45b   :  { %v828_v54 = vrot.slane %v827_v52, 2 }
 0x45c   :  { %v821_v55 = vrot.slane %v820_v53, 2 }
 0x45d   :  { %v829_v56 = vadd.f32 %v828_v54, %v827_v52 }
 0x45e   :  { %v822_v57 = vadd.f32 %v821_v55, %v820_v53  ;;  %v2174_v55 = vld [vmem:[%s3528_s5 + $0x7] ss:$0 sm:$0xff] }
 0x45f   :  { %v830_v58 = vrot.slane %v829_v56, 1 }
 0x460   :  { %v823_v2 = vrot.slane %v822_v57, 1 }
 0x461   :  { %v831_v59 = vadd.f32 %v830_v58, %v829_v56 }
 0x462   :  { %v824_v3 = vadd.f32 %v823_v2, %v822_v57  ;;  %v2175_v57 = vld [vmem:[%s3528_s5 + $0x8] ss:$0 sm:$0xff] }
 0x464   :  { %v845_v60 = vsel %vm844_vm3, %v831_v59, %v824_v3  ;;  %v1043_v59 = vld [vmem:[%s3527_s4 + $0x70] sm:$0xff]  ;;  %v1044_v3 = vld [vmem:[%s3527_s4 + $0x78] sm:$0xff] }
 0x465   :  { %2475 = vmatmul.mubr.msk.f32.vlgmr.msra.gmra.mrb[6].mxu0 %vm49_vm0, %v845_v60  ;;  %v2740_v60 = vpack.c.bf16 %v1044_v3, %v1043_v59 }
 0x466   :  { %2520 = vmatprep.mubr.msk.f32.mxu0 %vm2878_vm1, %v2879_v15  ;;  %2720 = vmatpush3.bf16.msra.mxu0 %v2719_v25  ;;  %v2184_v25 = vld [vmem:[%s3525_s2 + $0xb8] sm:$0xff] }
 0x467   :  { %2721 = vmatprep.subr.bf16.mxu0 %v2877_v11  ;;  %v2746_v26 = vpack.c.bf16 %v2184_v25, %v2183_v22 }
 0x46a   :  { %2723 = vmatpush3.bf16.msra.mxu0 %v2722_v28 }
 0x46b   :  { %2724 = vmatprep.subr.bf16.mxu0 %v2877_v11 }
 0x46e   :  { %2726 = vmatpush3.bf16.msra.mxu0 %v2725_v31 }
 0x46f   :  { %2727 = vmatprep.subr.bf16.mxu0 %v2877_v11 }
 0x472   :  { %2729 = vmatpush3.bf16.msra.mxu0 %v2728_v34 }
 0x473   :  { %2730 = vmatprep.subr.bf16.mxu0 %v2877_v11 }
 0x476   :  { %2732 = vmatpush3.bf16.msra.mxu0 %v2731_v37  ;;  %v2179_v37 = vld [vmem:[%s3528_s5 + $0x9] ss:$0 sm:$0xff] }
 0x477   :  { %2733 = vmatprep.subr.bf16.mxu0 %v2877_v11 }
 0x47a   :  { %2735 = vmatpush3.bf16.msra.mxu0 %v2734_v40 }
 0x47b   :  { %2736 = vmatprep.subr.bf16.mxu0 %v2877_v11 }
 0x47e   :  { %2738 = vmatpush3.bf16.msra.mxu0 %v2737_v45 }
 0x47f   :  { %2739 = vmatprep.subr.bf16.mxu0 %v2877_v11 }
 0x482   :  { %2741 = vmatpush3.bf16.msra.mxu0 %v2740_v60 }
 0x483   :  { %2770 = vmatprep.subr.bf16.mxu0 %v2877_v11 }
 0x538   :  { %v914_v62 = vpop.f32.mrb[6].mxu0 }
 0x539   :  { %v915_v63 = vadd.f32 %v2172_v61, %v914_v62  ;;  %v2476_v0 = vpop.f32.mrb[7].mxu0  ;;  %v2176_v61 = vld [vmem:[%s3529_s6] ss:$0 sm:$0xff] }
 0x53b   :  { %v3157_v6 = vadd.f32 %v915_v63, %v3047_v1  ;;  %v2713_v1 = vpack.c.bf16 %v947_v14, %v946_v13 }
 0x53d   :  { %v919_v7 = vsel %vm469_vm2, %v3157_v6, 0.0  ;;  %v923_v9 = vmul.f32 %v3157_v6, %v3157_v6  ;;  %2714 = vmatpush3.bf16.msra.mxu1 %v2713_v1 }
 0x53e   :  { %920 = vadd.xlane.f32.xlu1 %v919_v7  ;;  %2715 = vmatprep.subr.bf16.mxu1 %v2877_v11  ;;  %v2178_v7 = vld [vmem:[%s3528_s5 + $0xb] ss:$0 sm:$0xff] }
 0x53f   :  { %v924_v10 = vsel %vm469_vm2, %v923_v9, 0.0 }
 0x541   :  { %2717 = vmatpush3.bf16.msra.mxu1 %v2716_v18  ;;  %v2181_v18 = vld [vmem:[%s3525_s2 + $0xa0] sm:$0xff] }
 0x542   :  { %925 = vadd.xlane.f32.xlu1 %v924_v10  ;;  %2742 = vmatprep.subr.bf16.mxu1 %v2877_v11  ;;  %v2743_v21 = vpack.c.bf16 %v2182_v19, %v2181_v18  ;;  %v2144_v18 = vld [vmem:[%s3528_s5 + $0xe] ss:$0 sm:$0xff] }
 0x543   :  { %v298_v25 = vadd.f32 %v2986_v23, %v2144_v18 }
 0x5cb   :  { %v921_v46 = vpop.xlane.xlu1 %920 }
 0x5cc   :  { %v922_v47 = vmul.f32 0.03125, %v921_v46 }
 0x5ce   :  { %v928_v49 = vmul.f32 %v922_v47, %v922_v47  ;;  %v932_v53 = vsub.f32 %v3157_v6, %v922_v47 }
 0x5cf   :  { %v926_v48 = vpop.xlane.xlu1 %925 }
 0x5d0   :  { %v927_v50 = vmul.f32 0.03125, %v926_v48 }
 0x5d2   :  { %v929_v51 = vsub.f32 %v927_v50, %v928_v49 }
 0x5d4   :  { %v930_v52 = vadd.f32 1e-05, %v929_v51  ;;  %v2189_v51 = vld [vmem:[%s3525_s2 + $0xc0] sm:$0xff] }
 0x5d6   :  { %2833 = vrsqrt.f32 %v930_v52  ;;  %v2190_v52 = vld [vmem:[%s3525_s2 + $0xc8] sm:$0xff] }
 0x5e0   :  { %v2834_v54 = vpop.eup %2833 }
 0x5e1   :  { %v933_v56 = vmul.f32 %v2834_v54, %v932_v53  ;;  %v2749_v53 = vpack.c.bf16 %v2190_v52, %v2189_v51  ;;  %v2191_v54 = vld [vmem:[%s3525_s2 + $0xd0] sm:$0xff] }
 0x5e3   :  { %v939_v58 = vmul.f32 %v2174_v55, %v933_v56  ;;  %v2192_v55 = vld [vmem:[%s3525_s2 + $0xd8] sm:$0xff] }
 0x5e4   :  { %v2752_v56 = vpack.c.bf16 %v2192_v55, %v2191_v54 }
 0x5e5   :  { %v945_v2 = vadd.f32 %v2175_v57, %v939_v58 }
 0x5e7   :  { %2486 = vmatmul.mubr.msk.f32.vlgmr.msra.gmra.mrb[10].mxu1 %vm49_vm0, %v945_v2 }
 0x5e8   :  { %2531 = vmatprep.mubr.msk.f32.mxu1 %vm2878_vm1, %v2879_v15  ;;  %2744 = vmatpush3.bf16.msra.mxu1 %v2743_v21 }
 0x5e9   :  { %2745 = vmatprep.subr.bf16.mxu1 %v2877_v11 }
 0x5ec   :  { %2747 = vmatpush3.bf16.msra.mxu1 %v2746_v26 }
 0x5ed   :  { %2748 = vmatprep.subr.bf16.mxu1 %v2877_v11 }
 0x6ba   :  { %v1024_v62 = vpop.f32.mrb[10].mxu1 }
 0x6bb   :  { %v1025_v63 = vadd.f32 %v2176_v61, %v1024_v62  ;;  %v2487_v0 = vpop.f32.mrb[11].mxu1 }
 0x6bc   :  { %v2187_v0 = vld [vmem:[%s3528_s5 + $0x11] ss:$0 sm:$0xff] }
 0x6bd   :  { %v1028_v6 = vmax.f32 %v1025_v63, 0.0 }
 0x6bf   :  { %2521 = vmatmul.mubr.f32.vlgmr.msra.gmra.mrb[8].mxu0 %v1028_v6 }
 0x6c0   :  { %2575 = vmatprep.mubr.msk.f32.mxu0 %vm2878_vm1, %v2879_v15 }
 0x792   :  { %v1116_v9 = vpop.f32.mrb[8].mxu0 }
 0x793   :  { %v1117_v10 = vadd.f32 %v2178_v7, %v1116_v9  ;;  %v2522_v13 = vpop.f32.mrb[9].mxu0  ;;  %v2188_v7 = vld [vmem:[%s3528_s5 + $0x12] ss:$0 sm:$0xff] }
 0x794   :  { %v2193_v13 = vld [vmem:[%s3528_s5 + $0xd] ss:$0 sm:$0xff] }
 0x795   :  { %v1120_v14 = vadd.f32 %v1117_v10, %v945_v2 }
 0x797   :  { %v1121_v1 = vsel %vm469_vm2, %v1120_v14, 0.0  ;;  %v1125_v16 = vmul.f32 %v1120_v14, %v1120_v14 }
 0x798   :  { %1122 = vadd.xlane.f32.xlu0 %v1121_v1 }
 0x799   :  { %v1126_v17 = vsel %vm469_vm2, %v1125_v16, 0.0 }
 0x79a   :  { %1127 = vadd.xlane.f32.xlu1 %v1126_v17 }
 0x825   :  { %v1123_v28 = vpop.xlane.xlu0 %1122 }
 0x826   :  { %v1124_v29 = vmul.f32 0.03125, %v1123_v28 }
 0x827   :  { %v1128_v30 = vpop.xlane.xlu1 %1127 }
 0x828   :  { %v1130_v31 = vmul.f32 %v1124_v29, %v1124_v29  ;;  %v1129_v32 = vmul.f32 0.03125, %v1128_v30  ;;  %v1134_v35 = vsub.f32 %v1120_v14, %v1124_v29 }
 0x82a   :  { %v1131_v33 = vsub.f32 %v1129_v32, %v1130_v31 }
 0x82c   :  { %v1132_v34 = vadd.f32 1e-05, %v1131_v33 }
 0x82e   :  { %2835 = vrsqrt.f32 %v1132_v34 }
 0x838   :  { %v2836_v36 = vpop.eup %2835 }
 0x839   :  { %v1135_v38 = vmul.f32 %v2836_v36, %v1134_v35 }
 0x83b   :  { %v1141_v40 = vmul.f32 %v2179_v37, %v1135_v38 }
 0x83d   :  { %v1147_v42 = vadd.f32 %v2180_v39, %v1141_v40 }
 0x83f   :  { %2532 = vmatmul.mubr.msk.f32.vlgmr.msra.gmra.mrb[12].mxu1 %vm49_vm0, %v1147_v42 }
 0x840   :  { %2542 = vmatprep.mubr.msk.f32.mxu1 %vm2878_vm1, %v2879_v15  ;;  %2750 = vmatpush3.bf16.msra.mxu1 %v2749_v53 }
 0x841   :  { %2751 = vmatprep.subr.bf16.mxu1 %v2877_v11 }
 0x844   :  { %2753 = vmatpush3.bf16.msra.mxu1 %v2752_v56 }
 0x845   :  { %2755 = vmatprep.subr.bf16.mxu1 %v3065_v8 }
 0x912   :  { %v1227_v45 = vpop.f32.mrb[12].mxu1 }
 0x913   :  { %v1228_v46 = vadd.f32 %v2185_v44, %v1227_v45  ;;  %v2533_v47 = vpop.f32.mrb[13].mxu1 }
 0x915   :  { %v1231_v48 = vsel %vm469_vm2, %v1228_v46, 0.0  ;;  %v1235_v49 = vmul.f32 %v1228_v46, %v1228_v46 }
 0x916   :  { %1232 = vadd.xlane.f32.xlu0 %v1231_v48 }
 0x917   :  { %v1236_v50 = vsel %vm469_vm2, %v1235_v49, 0.0 }
 0x918   :  { %1237 = vadd.xlane.f32.xlu1 %v1236_v50 }
 0x9a3   :  { %v1233_v57 = vpop.xlane.xlu0 %1232 }
 0x9a4   :  { %v1234_v58 = vmul.f32 0.03125, %v1233_v57 }
 0x9a5   :  { %v1238_v2 = vpop.xlane.xlu1 %1237 }
 0x9a6   :  { %v1240_v59 = vmul.f32 %v1234_v58, %v1234_v58  ;;  %v1239_v3 = vmul.f32 0.03125, %v1238_v2  ;;  %v1244_v62 = vsub.f32 %v1228_v46, %v1234_v58 }
 0x9a8   :  { %v1241_v60 = vsub.f32 %v1239_v3, %v1240_v59 }
 0x9aa   :  { %v1242_v61 = vadd.f32 1e-05, %v1241_v60 }
 0x9ac   :  { %2837 = vrsqrt.f32 %v1242_v61 }
 0x9b6   :  { %v2838_v63 = vpop.eup %2837 }
 0x9b7   :  { %v1245_v6 = vmul.f32 %v2838_v63, %v1244_v62 }
 0x9b9   :  { %v1251_v9 = vmul.f32 %v2187_v0, %v1245_v6  ;;  %v2199_v0 = vld [vmem:[%s3525_s2 + $0x120] sm:$0xff]  ;;  %v2200_v6 = vld [vmem:[%s3525_s2 + $0x128] sm:$0xff] }
 0x9bb   :  { %v3302_v10 = vadd.f32 %v2188_v7, %v1251_v9  ;;  %v2771_v7 = vpack.c.bf16 %v2200_v6, %v2199_v0  ;;  %v2201_v9 = vld [vmem:[%s3525_s2 + $0x130] sm:$0xff] }
 0x9bd   :  { %2543 = vmatmul.mubr.msk.f32.vlgmr.msra.gmra.mrb[14].mxu1 %vm49_vm0, %v3302_v10  ;;  %2772 = vmatpush3.bf16.msra.mxu0 %v2771_v7 }
 0x9be   :  { %2757 = vmatpush3.bf16.msra.mxu1 %v3065_v8  ;;  %2773 = vmatprep.subr.bf16.mxu0 %v2877_v11 }
 0x9bf   :  { %2759 = vmatprep.subr.bf16.mxu1 %v3075_v12 }
 0x9c2   :  { %2761 = vmatpush3.bf16.msra.mxu1 %v3075_v12  ;;  %v293_v12 = vadd.f32 %v2144_v18, %v2988_v24 }
 0x9c3   :  { %2763 = vmatprep.subr.bf16.mxu1 %v3108_v41 }
 0xa90   :  { %v1337_v14 = vpop.f32.mrb[14].mxu1 }
 0xa91   :  { %v1338_v1 = vadd.f32 %v2193_v13, %v1337_v14  ;;  %v2544_v16 = vpop.f32.mrb[15].mxu1  ;;  %v2202_v13 = vld [vmem:[%s3525_s2 + $0x138] sm:$0xff] }
 0xa92   :  { %v2774_v14 = vpack.c.bf16 %v2202_v13, %v2201_v9 }
 0xa93   :  { %v1348_v17 = vrot.slane %v1338_v1, %v3083_v20  ;;  %v2151_v1 = vld [vmem:[%s3528_s5 + $0xf] ss:$0 sm:$0xff] }
 0xa94   :  { %2775 = vmatpush3.bf16.msra.mxu0 %v2774_v14  ;;  %v383_v16 = vadd.f32 %v3055_v4, %v2151_v1 }
 0xa95   :  { %v1349_v8 = vcombine.high %v1348_v17, %v1348_v17  ;;  %v1356_v19 = vrot.slane %v1348_v17, %v3083_v20  ;;  %2782 = vmatprep.subr.bf16.mxu0 %v2877_v11  ;;  %v378_v17 = vadd.f32 %v2151_v1, %v3057_v5 }
 0xa97   :  { %v1363_v21 = vrot.slane %v1349_v8, %v3083_v20  ;;  %v1367_v22 = vrot.slane %v1356_v19, %v3086_v27 }
 0xa99   :  { %v1371_v26 = vrot.slane %v1363_v21, %v3086_v27  ;;  %v1374_v28 = vmul.f32 %v1367_v22, %v293_v12 }
 0xa9b   :  { %v1375_v29 = vmul.f32 %v1371_v26, %v298_v25  ;;  %2553 = vmatprep.mubr.msk.f32.mxu1 %vm49_vm0, %v1374_v28 }
 0xa9d   :  { %2554 = vmatmul.mubr.msk.f32.vlgmr.msra.gmra.mrb[16].mxu1 %vm49_vm0, %v1375_v29 }
 0xa9e   :  { %2765 = vmatpush3.bf16.msra.mxu1 %v3108_v41 }
 0xa9f   :  { %2767 = vmatprep.subr.bf16.mxu1 %v3113_v43 }
 0xaa2   :  { %2769 = vmatpush3.bf16.msra.mxu1 %v3113_v43 }
 0xaa3   :  { %2776 = vmatprep.subr.bf16.mxu1 %v2877_v11 }
 0xb70   :  { %v2555_v24 = vpop.f32.mrb[16].mxu1 }
 0xb71   :  { %v1464_v20 = vsel %vm49_vm0, %v2555_v24, -inf  ;;  %v1448_v23 = vpop.f32.mrb[17].mxu1 }
 0xb72   :  { %v1465_v30 = vrot.slane %v1464_v20, 4  ;;  %v1457_v27 = vsel %vm49_vm0, %v1448_v23, -inf }
 0xb73   :  { %v1458_v31 = vrot.slane %v1457_v27, 4 }
 0xb74   :  { %v1466_v32 = vmax.f32 %v1464_v20, %v1465_v30 }
 0xb75   :  { %v1459_v33 = vmax.f32 %v1457_v27, %v1458_v31 }
 0xb76   :  { %v1467_v34 = vrot.slane %v1466_v32, 2 }
 0xb77   :  { %v1460_v35 = vrot.slane %v1459_v33, 2 }
 0xb78   :  { %v1468_v36 = vmax.f32 %v1466_v32, %v1467_v34 }
 0xb79   :  { %v1461_v41 = vmax.f32 %v1459_v33, %v1460_v35  ;;  %v2203_v33 = vld [vmem:[%s3528_s5 + $0x10] ss:$0 sm:$0xff] }
 0xb7a   :  { %v1469_v37 = vrot.slane %v1468_v36, 1 }
 0xb7b   :  { %v1462_v38 = vrot.slane %v1461_v41, 1 }
 0xb7c   :  { %v1470_v39 = vmax.f32 %v1468_v36, %v1469_v37 }
 0xb7d   :  { %v1463_v43 = vmax.f32 %v1461_v41, %v1462_v38 }
 0xb7e   :  { %v1472_v40 = vsub.f32 %v2555_v24, %v1470_v39 }
 0xb7f   :  { %v1471_v42 = vsub.f32 %v1448_v23, %v1463_v43  ;;  %v2207_v43 = vld [vmem:[%s3526_s3 + $0x20] sm:$0xff] }
 0xb80   :  { %v1475_v44 = vmul.f32 1.442695, %v1472_v40  ;;  %v2208_v40 = vld [vmem:[%s3526_s3 + $0x28] sm:$0xff] }
 0xb81   :  { %v1473_v45 = vmul.f32 1.442695, %v1471_v42  ;;  %v2209_v42 = vld [vmem:[%s3526_s3 + $0x30] sm:$0xff] }
 0xb82   :  { %2839 = vpow2.f32 %v1475_v44  ;;  %v2210_v44 = vld [vmem:[%s3526_s3 + $0x38] sm:$0xff] }
 0xb83   :  { %2841 = vpow2.f32 %v1473_v45  ;;  %v2780_v45 = vpack.c.bf16 %v2210_v44, %v2209_v42  ;;  %v2230_v44 = vld [vmem:[%s3528_s5 + $0x15] ss:$0 sm:$0xff] }
 0xb8c   :  { %v2840_v46 = vpop.eup %2839 }
 0xb8d   :  { %v2842_v47 = vpop.eup %2841  ;;  %v1484_v48 = vsel %vm49_vm0, %v2840_v46, 0.0 }
 0xb8e   :  { %v1485_v49 = vrot.slane %v1484_v48, 4  ;;  %v1477_v50 = vsel %vm49_vm0, %v2842_v47, 0.0 }
 0xb8f   :  { %v1478_v51 = vrot.slane %v1477_v50, 4 }
 0xb90   :  { %v1486_v52 = vadd.f32 %v1485_v49, %v1484_v48  ;;  %v2215_v48 = vld [vmem:[%s3527_s4 + $0x90] sm:$0xff] }
 0xb91   :  { %v1479_v53 = vadd.f32 %v1478_v51, %v1477_v50  ;;  %v2216_v50 = vld [vmem:[%s3527_s4 + $0x98] sm:$0xff] }
 0xb92   :  { %v1487_v54 = vrot.slane %v1486_v52, 2  ;;  %v2786_v51 = vpack.c.bf16 %v2216_v50, %v2215_v48 }
 0xb93   :  { %v1480_v55 = vrot.slane %v1479_v53, 2 }
 0xb94   :  { %v1488_v56 = vadd.f32 %v1487_v54, %v1486_v52  ;;  %v2217_v52 = vld [vmem:[%s3527_s4 + $0xa0] sm:$0xff] }
 0xb95   :  { %v1481_v57 = vadd.f32 %v1480_v55, %v1479_v53  ;;  %v2218_v53 = vld [vmem:[%s3527_s4 + $0xa8] sm:$0xff]  ;;  %v2219_v55 = vld [vmem:[%s3527_s4 + $0xb0] sm:$0xff] }
 0xb96   :  { %v1489_v58 = vrot.slane %v1488_v56, 1  ;;  %v2789_v54 = vpack.c.bf16 %v2218_v53, %v2217_v52  ;;  %v2234_v52 = vld [vmem:[%s3525_s2 + $0x140] sm:$0xff]  ;;  %v2235_v53 = vld [vmem:[%s3525_s2 + $0x148] sm:$0xff] }
 0xb97   :  { %v1482_v2 = vrot.slane %v1481_v57, 1 }
 0xb98   :  { %v1490_v59 = vadd.f32 %v1489_v58, %v1488_v56  ;;  %v2220_v56 = vld [vmem:[%s3527_s4 + $0xb8] sm:$0xff]  ;;  %v2221_v58 = vld [vmem:[%s3527_s4 + $0xc0] sm:$0xff] }
 0xb99   :  { %v1483_v3 = vadd.f32 %v1482_v2, %v1481_v57  ;;  %v2792_v57 = vpack.c.bf16 %v2220_v56, %v2219_v55  ;;  %v2222_v2 = vld [vmem:[%s3527_s4 + $0xc8] sm:$0xff]  ;;  %v2236_v55 = vld [vmem:[%s3525_s2 + $0x150] sm:$0xff]  ;;  %v2237_v56 = vld [vmem:[%s3525_s2 + $0x158] sm:$0xff] }
 0xb9a   :  { %2843 = vrcp.f32 %v1490_v59  ;;  %v2795_v59 = vpack.c.bf16 %v2222_v2, %v2221_v58 }
 0xb9b   :  { %2845 = vrcp.f32 %v1483_v3  ;;  %v2223_v3 = vld [vmem:[%s3527_s4 + $0xd0] sm:$0xff] }
 0xba4   :  { %v2844_v60 = vpop.eup %2843 }
 0xba5   :  { %v2846_v61 = vpop.eup %2845  ;;  %v1494_v63 = vmul.f32 %v2844_v60, %v2840_v46  ;;  %v2213_v46 = vld [vmem:[%s3527_s4 + $0x80] sm:$0xff]  ;;  %v2224_v60 = vld [vmem:[%s3527_s4 + $0xd8] sm:$0xff] }
 0xba6   :  { %v1492_v62 = vmul.f32 %v2846_v61, %v2842_v47  ;;  %v2214_v47 = vld [vmem:[%s3527_s4 + $0x88] sm:$0xff]  ;;  %v2798_v61 = vpack.c.bf16 %v2224_v60, %v2223_v3 }
 0xba7   :  { %v2783_v49 = vpack.c.bf16 %v2214_v47, %v2213_v46  ;;  %v2231_v46 = vld [vmem:[%s3528_s5 + $0x16] ss:$0 sm:$0xff] }
 0xba8   :  { %2564 = vmatprep.mubr.msk.f32.mxu1 %vm49_vm0, %v1492_v62  ;;  %v2225_v62 = vld [vmem:[%s3527_s4 + $0xe0] sm:$0xff] }
 0xba9   :  { %2565 = vmatmul.mubr.msk.f32.vlgmr.msra.gmra.mrb[18].mxu1 %vm49_vm0, %v1494_v63  ;;  %v2226_v63 = vld [vmem:[%s3527_s4 + $0xe8] sm:$0xff] }
 0xbaa   :  { %2586 = vmatprep.mubr.msk.f32.mxu1 %vm2878_vm1, %v2879_v15  ;;  %v2801_v0 = vpack.c.bf16 %v2226_v63, %v2225_v62 }
 0xc7c   :  { %v2566_v18 = vpop.f32.mrb[18].mxu1 }
 0xc7d   :  { %v1577_v8 = vmul.f32 %v2566_v18, %v383_v16  ;;  %v1567_v19 = vpop.f32.mrb[19].mxu1 }
 0xc7e   :  { %v1576_v12 = vmul.f32 %v1567_v19, %v378_v17 }
 0xc7f   :  { %v1585_v21 = vsel %vm49_vm0, %v1577_v8, 0.0  ;;  %v2205_v8 = vld [vmem:[%s3528_s5 + $0x13] ss:$0 sm:$0xff] }
 0xc80   :  { %v1586_v22 = vrot.slane %v1585_v21, 4  ;;  %v1578_v25 = vsel %vm49_vm0, %v1576_v12, 0.0  ;;  %v2206_v12 = vld [vmem:[%s3528_s5 + $0x14] ss:$0 sm:$0xff] }
 0xc81   :  { %v1579_v26 = vrot.slane %v1578_v25, 4 }
 0xc82   :  { %v1587_v28 = vadd.f32 %v1586_v22, %v1585_v21 }
 0xc83   :  { %v1580_v29 = vadd.f32 %v1579_v26, %v1578_v25  ;;  %v2227_v25 = vld [vmem:[%s3527_s4 + $0xf0] sm:$0xff]  ;;  %v2228_v26 = vld [vmem:[%s3527_s4 + $0xf8] sm:$0xff] }
 0xc84   :  { %v1588_v24 = vrot.slane %v1587_v28, 2 }
 0xc85   :  { %v1581_v20 = vrot.slane %v1580_v29, 2 }
 0xc86   :  { %v1589_v23 = vadd.f32 %v1588_v24, %v1587_v28  ;;  %v2804_v28 = vpack.c.bf16 %v2228_v26, %v2227_v25 }
 0xc87   :  { %v1582_v30 = vadd.f32 %v1581_v20, %v1580_v29  ;;  %v2211_v29 = vld [vmem:[%s3529_s6 + $0x1] ss:$0 sm:$0xff] }
 0xc88   :  { %v1590_v27 = vrot.slane %v1589_v23, 1 }
 0xc89   :  { %v1583_v4 = vrot.slane %v1582_v30, 1 }
 0xc8a   :  { %v1591_v31 = vadd.f32 %v1590_v27, %v1589_v23  ;;  %v2229_v27 = vld [vmem:[%s3528_s5 + $0x17] ss:$0 sm:$0xff] }
 0xc8b   :  { %v1584_v5 = vadd.f32 %v1583_v4, %v1582_v30 }
 0xc8d   :  { %v1604_v32 = vsel %vm844_vm3, %v1591_v31, %v1584_v5 }
 0xc8e   :  { %2576 = vmatmul.mubr.msk.f32.vlgmr.msra.gmra.mrb[10].mxu0 %vm49_vm0, %v1604_v32 }
 0xc8f   :  { %2621 = vmatprep.mubr.msk.f32.mxu0 %vm2878_vm1, %v2879_v15  ;;  %2784 = vmatpush3.bf16.msra.mxu0 %v2783_v49 }
 0xc90   :  { %2785 = vmatprep.subr.bf16.mxu0 %v2877_v11 }
 0xc93   :  { %2787 = vmatpush3.bf16.msra.mxu0 %v2786_v51 }
 0xc94   :  { %2788 = vmatprep.subr.bf16.mxu0 %v2877_v11 }
 0xc97   :  { %2790 = vmatpush3.bf16.msra.mxu0 %v2789_v54  ;;  %v2807_v54 = vpack.c.bf16 %v2235_v53, %v2234_v52 }
 0xc98   :  { %2791 = vmatprep.subr.bf16.mxu0 %v2877_v11 }
 0xc9b   :  { %2793 = vmatpush3.bf16.msra.mxu0 %v2792_v57  ;;  %v2810_v57 = vpack.c.bf16 %v2237_v56, %v2236_v55 }
 0xc9c   :  { %2794 = vmatprep.subr.bf16.mxu0 %v2877_v11 }
 0xc9f   :  { %2796 = vmatpush3.bf16.msra.mxu0 %v2795_v59 }
 0xca0   :  { %2797 = vmatprep.subr.bf16.mxu0 %v2877_v11 }
 0xca3   :  { %2799 = vmatpush3.bf16.msra.mxu0 %v2798_v61 }
 0xca4   :  { %2800 = vmatprep.subr.bf16.mxu0 %v2877_v11 }
 0xca7   :  { %2802 = vmatpush3.bf16.msra.mxu0 %v2801_v0 }
 0xca8   :  { %2803 = vmatprep.subr.bf16.mxu0 %v2877_v11 }
 0xcab   :  { %2805 = vmatpush3.bf16.msra.mxu0 %v2804_v28 }
 0xd61   :  { %v1673_v34 = vpop.f32.mrb[10].mxu0 }
 0xd62   :  { %v1674_v35 = vadd.f32 %v2203_v33, %v1673_v34  ;;  %v2577_v36 = vpop.f32.mrb[11].mxu0 }
 0xd64   :  { %v3366_v41 = vadd.f32 %v1674_v35, %v3302_v10  ;;  %v2777_v10 = vpack.c.bf16 %v2208_v40, %v2207_v43 }
 0xd66   :  { %v1678_v37 = vsel %vm469_vm2, %v3366_v41, 0.0  ;;  %v1682_v38 = vmul.f32 %v3366_v41, %v3366_v41  ;;  %2778 = vmatpush3.bf16.msra.mxu1 %v2777_v10 }
 0xd67   :  { %1679 = vadd.xlane.f32.xlu0 %v1678_v37  ;;  %2779 = vmatprep.subr.bf16.mxu1 %v2877_v11 }
 0xd68   :  { %v1683_v39 = vsel %vm469_vm2, %v1682_v38, 0.0 }
 0xd69   :  { %1684 = vadd.xlane.f32.xlu1 %v1683_v39 }
 0xd6a   :  { %2781 = vmatpush3.bf16.msra.mxu1 %v2780_v45 }
 0xd6b   :  { %2806 = vmatprep.subr.bf16.mxu1 %v2877_v11 }
 0xdf4   :  { %v1680_v6 = vpop.xlane.xlu0 %1679 }
 0xdf5   :  { %v1681_v7 = vmul.f32 0.03125, %v1680_v6  ;;  %v2232_v6 = vld [vmem:[%s3528_s5 + $0x18] ss:$0 sm:$0xff] }
 0xdf6   :  { %v1685_v9 = vpop.xlane.xlu1 %1684 }
 0xdf7   :  { %v1687_v13 = vmul.f32 %v1681_v7, %v1681_v7  ;;  %v1686_v14 = vmul.f32 0.03125, %v1685_v9  ;;  %v1691_v17 = vsub.f32 %v3366_v41, %v1681_v7  ;;  %v2240_v9 = vld [vmem:[%s3526_s3 + $0x40] sm:$0xff] }
 0xdf9   :  { %v1688_v1 = vsub.f32 %v1686_v14, %v1687_v13  ;;  %v2241_v13 = vld [vmem:[%s3526_s3 + $0x48] sm:$0xff]  ;;  %v2233_v14 = vld [vmem:[%s3528_s5 + $0x19] ss:$0 sm:$0xff] }
 0xdfb   :  { %v1689_v16 = vadd.f32 1e-05, %v1688_v1 }
 0xdfd   :  { %2847 = vrsqrt.f32 %v1689_v16  ;;  %v2813_v16 = vpack.c.bf16 %v2241_v13, %v2240_v9 }
 0xe07   :  { %v2848_v18 = vpop.eup %2847 }
 0xe08   :  { %v1692_v19 = vmul.f32 %v2848_v18, %v1691_v17  ;;  %v2242_v18 = vld [vmem:[%s3526_s3 + $0x50] sm:$0xff] }
 0xe0a   :  { %v1698_v21 = vmul.f32 %v2205_v8, %v1692_v19  ;;  %v2243_v8 = vld [vmem:[%s3526_s3 + $0x58] sm:$0xff]  ;;  %s2853_s3 = scalar_lea.vmem %s2111_s30, 32 }
 0xe0b   :  { %v2816_v19 = vpack.c.bf16 %v2243_v8, %v2242_v18  ;;  %p2854_p0 = scmp.ne.s32.totalorder %s2111_s30, %s2853_s3  ;;  %p2859_p2 = scmp.lt.s32.totalorder %s2853_s3, %s2853_s3 }
 0xe0c   :  { %v1704_v22 = vadd.f32 %v2206_v12, %v1698_v21  ;;  %v2238_v12 = vld [vmem:[%s3528_s5 + $0x1a] ss:$0 sm:$0xff] }
 0xe0d   :  { %p2860_p3 = por %p2859_p2, %p2858_p1 }
 0xe0e   :  { %2587 = vmatmul.mubr.msk.f32.vlgmr.msra.gmra.mrb[20].mxu1 %vm49_vm0, %v1704_v22 }
 0xe0f   :  { %2632 = vmatprep.mubr.msk.f32.mxu1 %vm2878_vm1, %v2879_v15  ;;  %2808 = vmatpush3.bf16.msra.mxu1 %v2807_v54  ;;  %p2861_p4 = pnand %p2860_p3, %p2854_p0 }
 0xe10   :  { %2809 = vmatprep.subr.bf16.mxu1 %v2877_v11 }
 0xe13   :  { %2811 = vmatpush3.bf16.msra.mxu1 %v2810_v57 }
 0xe14   :  { %2812 = vmatprep.subr.bf16.mxu1 %v2877_v11 }
 0xee1   :  { %v1784_v24 = vpop.f32.mrb[20].mxu1 }
 0xee2   :  { %v1785_v20 = vadd.f32 %v2211_v29, %v1784_v24  ;;  %v2588_v23 = vpop.f32.mrb[21].mxu1 }
 0xee4   :  { %v1788_v30 = vmax.f32 %v1785_v20, 0.0 }
 0xee6   :  { %2622 = vmatmul.mubr.f32.vlgmr.msra.gmra.mrb[12].mxu0 %v1788_v30 }
 0xfb9   :  { %v1877_v4 = vpop.f32.mrb[12].mxu0 }
 0xfba   :  { %v1878_v31 = vadd.f32 %v2229_v27, %v1877_v4  ;;  %v2623_v5 = vpop.f32.mrb[13].mxu0 }
 0xfbc   :  { %v1881_v32 = vadd.f32 %v1878_v31, %v1704_v22 }
 0xfbe   :  { %v1882_v33 = vsel %vm469_vm2, %v1881_v32, 0.0  ;;  %v1886_v34 = vmul.f32 %v1881_v32, %v1881_v32 }
 0xfbf   :  { %1883 = vadd.xlane.f32.xlu0 %v1882_v33 }
 0xfc0   :  { %v1887_v35 = vsel %vm469_vm2, %v1886_v34, 0.0 }
 0xfc1   :  { %1888 = vadd.xlane.f32.xlu1 %v1887_v35 }
0x104c   :  { %v1884_v36 = vpop.xlane.xlu0 %1883 }
0x104d   :  { %v1885_v41 = vmul.f32 0.03125, %v1884_v36 }
0x104e   :  { %v1889_v37 = vpop.xlane.xlu1 %1888 }
0x104f   :  { %v1891_v38 = vmul.f32 %v1885_v41, %v1885_v41  ;;  %v1890_v39 = vmul.f32 0.03125, %v1889_v37  ;;  %v1895_v10 = vsub.f32 %v1881_v32, %v1885_v41 }
0x1051   :  { %v1892_v43 = vsub.f32 %v1890_v39, %v1891_v38 }
0x1053   :  { %v1893_v40 = vadd.f32 1e-05, %v1892_v43 }
0x1055   :  { %2849 = vrsqrt.f32 %v1893_v40 }
0x105f   :  { %v2850_v42 = vpop.eup %2849 }
0x1060   :  { %v1896_v45 = vmul.f32 %v2850_v42, %v1895_v10 }
0x1062   :  { %v1902_v47 = vmul.f32 %v2230_v44, %v1896_v45 }
0x1064   :  { %v1908_v48 = vadd.f32 %v2231_v46, %v1902_v47 }
0x1066   :  { %v1909_v49 = vsel %vm469_vm2, %v1908_v48, 0.0  ;;  %v1913_v50 = vmul.f32 %v1908_v48, %v1908_v48 }
0x1067   :  { %1910 = vadd.xlane.f32.xlu0 %v1909_v49 }
0x1068   :  { %v1914_v51 = vsel %vm469_vm2, %v1913_v50, 0.0 }
0x1069   :  { %1915 = vadd.xlane.f32.xlu1 %v1914_v51 }
0x10f4   :  { %v1911_v58 = vpop.xlane.xlu0 %1910 }
0x10f5   :  { %v1912_v2 = vmul.f32 0.03125, %v1911_v58 }
0x10f6   :  { %v1916_v59 = vpop.xlane.xlu1 %1915 }
0x10f7   :  { %v1918_v3 = vmul.f32 %v1912_v2, %v1912_v2  ;;  %v1917_v60 = vmul.f32 0.03125, %v1916_v59  ;;  %v1922_v63 = vsub.f32 %v1908_v48, %v1912_v2 }
0x10f9   :  { %v1919_v61 = vsub.f32 %v1917_v60, %v1918_v3 }
0x10fb   :  { %v1920_v62 = vadd.f32 1e-05, %v1919_v61 }
0x10fd   :  { %2851 = vrsqrt.f32 %v1920_v62 }
0x1107   :  { %v2852_v0 = vpop.eup %2851 }
0x1108   :  { %v1923_v7 = vmul.f32 %v2852_v0, %v1922_v63 }
0x110a   :  { %v1929_v1 = vmul.f32 %v2232_v6, %v1923_v7 }
0x110c   :  { %v1935_v17 = vadd.f32 %v2233_v14, %v1929_v1 }
0x110e   :  { %2633 = vmatmul.mubr.msk.f32.vlgmr.msra.gmra.mrb[22].mxu1 %vm49_vm0, %v1935_v17 }
0x110f   :  { %2814 = vmatpush3.bf16.msra.mxu1 %v2813_v16  ;;  %2643 = vmatprep.mubr.msk.f32.mxu1 %vm2878_vm1, %v2879_v15 }
0x1110   :  { %2815 = vmatprep.subr.bf16.mxu1 %v2877_v11  ;;  %v2244_v11 = vld [vmem:[%s3529_s6 + $0x2] ss:$0 sm:$0xff] }
0x1113   :  { %2817 = vmatpush3.bf16.msra.mxu1 %v2816_v19 }
0x11e1   :  { %v2015_v21 = vpop.f32.mrb[22].mxu1 }
0x11e2   :  { %v2016_v22 = vadd.f32 %v2238_v12, %v2015_v21  ;;  %v2634_v25 = vpop.f32.mrb[23].mxu1 }
0x11e4   :  { %v2019_v15 = vmax.f32 %v2016_v22, 0.0 }
0x11e6   :  { %2644 = vmatmul.mubr.msk.f32.vlgmr.msra.gmra.mrb[24].mxu1 %vm49_vm0, %v2019_v15 }
0x12b9   :  { %v2099_v26 = vpop.f32.mrb[24].mxu1 }
0x12ba   :  { %v2100_v28 = vadd.f32 %v2244_v11, %v2099_v26  ;;  %v2645_v29 = vpop.f32.mrb[25].mxu1 }
0x12bc   :  { %2103 = vst [vmem:[#allocation2] sm:$0x3] %v2100_v28 }
0x12bd   :  { %2864 = shalt.err (!%p2861_p4)
}
0x12be   :  { %s2865_s9 = scalar_lea.hbm %s3530_s7, 32 }
0x12bf   :  { %p2866_p5 = scmp.ne.s32.totalorder %s3530_s7, %s2865_s9  ;;  %p2869_p6 = scmp.lt.u32.totalorder %s2865_s9, %s3530_s7 }
0x12c1   :  { %p2871_p7 = pnand %p2869_p6, %p2866_p5 }
0x12c3   :  { %2874 = shalt.err (!%p2871_p7)
}
0x12c4   :  { %2113 = dma.vmem_to_hbm [thread:$0]  %s2111_s30, 32, %s3530_s7, [#allocation3]  }
0x12c5   :  { %2875 = dma.done.wait [#allocation3], 32  }
0x12c6   :  { %2876 = vsyncadd [#allocation3], 4294967264 }
0x12c7   :  { %2117 = vsyncpa [#allocation3], 1 }

</bundles_post_ra>
